<compile_context>
chip_gen: v6e
topology: v6e:2x2x1
jax: 0.10.0
libtpu: 0.0.40
codegen_flags: <defaults>
</compile_context>

<pallas_src>
import math
from functools import partial

import jax
import jax.numpy as jnp
from jax.experimental import pallas as pl
from jax.experimental.pallas import tpu as pltpu

F32 = jnp.float32
BF16 = jnp.bfloat16


def _layer_norm(x, w, b, eps=1e-5):
    mu = jnp.mean(x, axis=-1, keepdims=True)
    xc = x - mu
    var = jnp.mean(xc * xc, axis=-1, keepdims=True)
    return xc * jax.lax.rsqrt(var + eps) * w + b


def _mxu(a, b):
    """Matmul with bf16 MXU operands and f32 accumulation."""
    return jnp.dot(a.astype(BF16), b.astype(BF16), preferred_element_type=F32)


# --------------------- shared math (kernel body == matched reference) --------------------- #

def _forward_math(x, sid_r, sid_c, pool,
                  wqkv, bqkv, wo, bo, ln1w, ln1b, w1, b1, w2, b2, ln2w, ln2b,
                  fc_w, fc_b, *, n_heads, n_layers):
    # x: (N, D) f32 activation slab, row i = (s, b).  PyTorch's encoder (batch_first=False)
    # attends over dim 0 (= B) independently for each s -> block-diagonal same-s mask.
    n, d_model = x.shape
    hd = d_model // n_heads

    neg_bias = jnp.where(sid_r == sid_c, 0.0, -1e30).astype(F32)       # (N, N)

    for l in range(n_layers):                         # static unroll over layers
        # fused QKV projection: one (N,D)x(D,3D) MXU op (Q pre-scaled by 1/sqrt(hd))
        qkv = _mxu(x, wqkv[l]) + bqkv[l]              # (N, 3D) f32

        # head-batched attention: (H, N, hd) slabs, ONE score matmul / softmax / PV
        q3 = jnp.stack([qkv[:, h * hd:(h + 1) * hd]
                        for h in range(n_heads)], 0).astype(BF16)
        k3 = jnp.stack([qkv[:, d_model + h * hd:d_model + (h + 1) * hd]
                        for h in range(n_heads)], 0).astype(BF16)
        v3 = jnp.stack([qkv[:, 2 * d_model + h * hd:2 * d_model + (h + 1) * hd]
                        for h in range(n_heads)], 0).astype(BF16)

        s = jnp.einsum('hne,hme->hnm', q3, k3,
                       preferred_element_type=F32) + neg_bias[None]    # (H, N, N) f32
        s = s - jnp.max(s, axis=-1, keepdims=True)
        p = jnp.exp(s)
        p = p / jnp.sum(p, axis=-1, keepdims=True)                     # exact softmax (f32)
        o3 = jnp.einsum('hnm,hme->hne', p.astype(BF16), v3,
                        preferred_element_type=F32)                    # (H, N, hd) f32

        # single out-projection matmul on the concatenated heads
        o_cat = jnp.concatenate([o3[h] for h in range(n_heads)], axis=-1)   # (N, D)
        attn = _mxu(o_cat, wo[l]) + bo[l]

        # post-norm encoder layer (norm_first=False); dropout == identity (eval)
        x1 = _layer_norm(x + attn, ln1w[l], ln1b[l])
        h1 = jnp.maximum(_mxu(x1, w1[l]) + b1[l], 0.0)
        h2 = _mxu(h1, w2[l]) + b2[l]
        x = _layer_norm(x1 + h2, ln2w[l], ln2b[l])

    # classifier head: mean over S (pool matmul == torch.mean(dim=1)) + fc, lane-dense out
    pooled = _mxu(pool, x)                                             # (B, D) f32
    return _mxu(pooled, fc_w) + fc_b                                   # (B, OUT_padded) f32


# ------------------------------------ Pallas kernel ------------------------------------ #

def fused_transformer_kernel(*refs, n_heads, n_layers):
    *in_refs, o_ref = refs
    vals = [r[...] for r in in_refs]                  # whole slabs are VMEM-resident
    o_ref[...] = _forward_math(*vals, n_heads=n_heads, n_layers=n_layers)


# ---------------------------------------- wrapper --------------------------------------- #

def prepare_inputs(text, emb_table, layer_params, fc_w_t, fc_b, n_heads):
    """Build the (stacked / bf16-cast / padded) argument tuple fed to the kernel."""
    B, S = text.shape
    D = emb_table.shape[1]
    hd = D // n_heads
    scale = 1.0 / math.sqrt(hd)
    out_dim = fc_w_t.shape[1]
    out_pad = ((out_dim + 127) // 128) * 128          # lane-dense output slab

    # glue (plain JAX): embedding gather + sqrt(D) scale; dropout == identity
    embedded = emb_table[text] * math.sqrt(D)                          # (B, S, D)
    x2 = jnp.transpose(embedded, (1, 0, 2)).reshape(S * B, D).astype(F32)  # row i = (s, b)

    # tiny segment-id vectors (mask is built in-kernel; no dense (N,N) HBM input)
    sid = (jnp.arange(S * B, dtype=jnp.int32) // B).astype(F32)
    sid_r = sid[:, None]                                               # (N, 1)
    sid_c = sid[None, :]                                               # (1, N)

    # pooling matrix: pooled[b] = (1/S) * sum_s x2[s*B + b]  (== torch.mean(dim=1))
    bid = jnp.arange(S * B, dtype=jnp.int32) % B
    pool = ((jnp.arange(B, dtype=jnp.int32)[:, None] == bid[None, :]).astype(F32)
            * (1.0 / S)).astype(BF16)                                  # (B, N)

    def stack(name):
        return jnp.stack([p[name] for p in layer_params], axis=0)

    # fold 1/sqrt(hd) into Q weight & bias columns, cast MXU-operand weights to bf16
    wqkv = stack('wqkv').at[:, :, :D].multiply(scale).astype(BF16)     # (L, D, 3D)
    bqkv = stack('bqkv').at[:, :, :D].multiply(scale)                  # (L, 1, 3D) f32

    fc_w_p = jnp.zeros((D, out_pad), F32).at[:, :out_dim].set(fc_w_t).astype(BF16)
    fc_b_p = jnp.zeros((1, out_pad), F32).at[:, :out_dim].set(fc_b)

    args = (x2, sid_r, sid_c, pool,
            wqkv, bqkv, stack('wo').astype(BF16), stack('bo'),
            stack('ln1w'), stack('ln1b'), stack('w1').astype(BF16), stack('b1'),
            stack('w2').astype(BF16), stack('b2'), stack('ln2w'), stack('ln2b'),
            fc_w_p, fc_b_p)
    return args, out_dim, out_pad


def transformer_classifier_forward(text, emb_table, layer_params, fc_w_t, fc_b, n_heads):
    B, _ = text.shape
    L = len(layer_params)
    args, out_dim, out_pad = prepare_inputs(text, emb_table, layer_params,
                                            fc_w_t, fc_b, n_heads)

    in_bytes = sum(int(a.size) * a.dtype.itemsize for a in args)
    out_bytes = B * out_pad * 4
    vmem_limit = int(max(32 << 20, 2 * (in_bytes + out_bytes) + (16 << 20)))

    out = pl.pallas_call(
        partial(fused_transformer_kernel, n_heads=n_heads, n_layers=L),
        out_shape=jax.ShapeDtypeStruct((B, out_pad), F32),
        in_specs=[pl.BlockSpec(memory_space=pltpu.MemorySpace.VMEM)] * len(args),
        out_specs=pl.BlockSpec(memory_space=pltpu.MemorySpace.VMEM),
        compiler_params=pltpu.CompilerParams(vmem_limit_bytes=vmem_limit),
    )(*args)
    return out[:, :out_dim]


# -------------------------- references (matched-bf16 and pure f32) -------------------------- #

def matched_ref_forward(text, emb_table, layer_params, fc_w_t, fc_b, n_heads):
    """Exact same math as the kernel (same prepared args), executed by plain XLA."""
    L = len(layer_params)
    args, out_dim, _ = prepare_inputs(text, emb_table, layer_params, fc_w_t, fc_b, n_heads)
    return _forward_math(*args, n_heads=n_heads, n_layers=L)[:, :out_dim]


def _ref_layer(x, p, n_heads):
    S, B, D = x.shape
    hd = D // n_heads
    qkv = jnp.einsum('sbd,de->sbe', x, p['wqkv']) + p['bqkv']
    q, k, v = qkv[..., :D], qkv[..., D:2 * D], qkv[..., 2 * D:]
    qh = q.reshape(S, B, n_heads, hd) / math.sqrt(hd)
    kh = k.reshape(S, B, n_heads, hd)
    vh = v.reshape(S, B, n_heads, hd)
    scores = jnp.einsum('sihd,sjhd->shij', qh, kh)
    probs = jax.nn.softmax(scores, axis=-1)
    o = jnp.einsum('shij,sjhd->sihd', probs, vh).reshape(S, B, D)
    attn = o @ p['wo'] + p['bo']
    x1 = _layer_norm(x + attn, p['ln1w'], p['ln1b'])
    ff = jnp.maximum(x1 @ p['w1'] + p['b1'], 0.0) @ p['w2'] + p['b2']
    return _layer_norm(x1 + ff, p['ln2w'], p['ln2b'])


def ref_forward(text, emb_table, layer_params, fc_w_t, fc_b, n_heads):
    """Pure f32 reference with PyTorch TransformerClassifier semantics."""
    D = emb_table.shape[1]
    x = emb_table[text] * math.sqrt(D)                 # (B, S, D)
    xt = jnp.transpose(x, (1, 0, 2))                   # PyTorch attends over dim 0
    for p in layer_params:
        xt = _ref_layer(xt, p, n_heads)
    pooled = jnp.mean(xt, axis=0)                      # == torch.mean(output, dim=1)
    return pooled @ fc_w_t + fc_b


# ------------------------------------ params / main ------------------------------------ #

def init_params(key, D, H, out_dim, n_layers, vocab):
    k_emb, key = jax.random.split(key)
    emb_table = jax.random.normal(k_emb, (vocab, D), F32)
    layers = []
    for _ in range(n_layers):
        ks = jax.random.split(key, 7)
        key = ks[0]
        layers.append(dict(
            wqkv=0.1 * jax.random.normal(ks[1], (D, 3 * D), F32),   # in_proj_weight.T
            bqkv=0.02 * jax.random.normal(ks[2], (1, 3 * D), F32),
            wo=0.1 * jax.random.normal(ks[3], (D, D), F32),         # out_proj.weight.T
            bo=jnp.zeros((1, D), F32),
            ln1w=jnp.ones((1, D), F32),
            ln1b=jnp.zeros((1, D), F32),
            w1=0.1 * jax.random.normal(ks[4], (D, H), F32),         # linear1.weight.T
            b1=0.02 * jax.random.normal(ks[5], (1, H), F32),
            w2=0.1 * jax.random.normal(ks[6], (H, D), F32),         # linear2.weight.T
            b2=jnp.zeros((1, D), F32),
            ln2w=jnp.ones((1, D), F32),
            ln2b=jnp.zeros((1, D), F32),
        ))
    k_fc, k_fcb, _ = jax.random.split(key, 3)
    fc_w_t = 0.1 * jax.random.normal(k_fc, (D, out_dim), F32)        # fc.weight.T
    fc_b = 0.02 * jax.random.normal(k_fcb, (1, out_dim), F32)
    return emb_table, layers, fc_w_t, fc_b


if __name__ == "__main__":
    B, S, D, H, OUT = 2, 8, 32, 64, 5
    n_heads, n_layers, vocab = 4, 2, 50

    key = jax.random.PRNGKey(0)
    k_tok, k_par = jax.random.split(key)
    text = jax.random.randint(k_tok, (B, S), 0, vocab, dtype=jnp.int32)
    emb_table, layers, fc_w_t, fc_b = init_params(k_par, D, H, OUT, n_layers, vocab)

    out = transformer_classifier_forward(text, emb_table, layers, fc_w_t, fc_b, n_heads)
    out = jax.block_until_ready(out)
    assert out.shape == (B, OUT), out.shape

    # Tight check: identical math (bf16 MXU operands, f32 elementwise) run by plain XLA.
    ref_m = matched_ref_forward(text, emb_table, layers, fc_w_t, fc_b, n_heads)
    if not jnp.allclose(out, ref_m, rtol=2e-3, atol=2e-3):
        raise AssertionError(
            f"mismatch vs bf16-matched reference, "
            f"max abs err = {float(jnp.max(jnp.abs(out - ref_m)))}")

    # Sanity check vs full-f32 PyTorch-semantics reference (loose: bf16 MXU operands).
    ref_f = ref_forward(text, emb_table, layers, fc_w_t, fc_b, n_heads)
    if not jnp.allclose(out, ref_f, rtol=5e-2, atol=5e-2):
        raise AssertionError(
            f"mismatch vs f32 reference, "
            f"max abs err = {float(jnp.max(jnp.abs(out - ref_f)))}")

    print("KERNEL_OK")
</pallas_src>

<mosaic_0001>
module attributes {stable_mosaic.version = 11 : i64} {
  func.func @fused_transformer_kernel(%arg0: memref<16x32xf32, #tpu.memory_space<vmem>>, %arg1: memref<16x1xf32, #tpu.memory_space<vmem>>, %arg2: memref<1x16xf32, #tpu.memory_space<vmem>>, %arg3: memref<2x16xbf16, #tpu.memory_space<vmem>>, %arg4: memref<2x32x96xbf16, #tpu.memory_space<vmem>>, %arg5: memref<2x1x96xf32, #tpu.memory_space<vmem>>, %arg6: memref<2x32x32xbf16, #tpu.memory_space<vmem>>, %arg7: memref<2x1x32xf32, #tpu.memory_space<vmem>>, %arg8: memref<2x1x32xf32, #tpu.memory_space<vmem>>, %arg9: memref<2x1x32xf32, #tpu.memory_space<vmem>>, %arg10: memref<2x32x64xbf16, #tpu.memory_space<vmem>>, %arg11: memref<2x1x64xf32, #tpu.memory_space<vmem>>, %arg12: memref<2x64x32xbf16, #tpu.memory_space<vmem>>, %arg13: memref<2x1x32xf32, #tpu.memory_space<vmem>>, %arg14: memref<2x1x32xf32, #tpu.memory_space<vmem>>, %arg15: memref<2x1x32xf32, #tpu.memory_space<vmem>>, %arg16: memref<32x128xbf16, #tpu.memory_space<vmem>>, %arg17: memref<1x128xf32, #tpu.memory_space<vmem>>, %arg18: memref<2x128xf32, #tpu.memory_space<vmem>>) attributes {dimension_semantics = [], scalar_prefetch = 0 : i64, scratch_operands = 0 : i64, tpu.core_type = #tpu.core_type<tc>} {
    %c0 = arith.constant 0 : index
    %c0_0 = arith.constant 0 : index
    %0 = vector.load %arg0[%c0, %c0_0] : memref<16x32xf32, #tpu.memory_space<vmem>>, vector<16x32xf32>
    %c0_1 = arith.constant 0 : index
    %c0_2 = arith.constant 0 : index
    %1 = vector.load %arg1[%c0_1, %c0_2] : memref<16x1xf32, #tpu.memory_space<vmem>>, vector<16x1xf32>
    %c0_3 = arith.constant 0 : index
    %c0_4 = arith.constant 0 : index
    %2 = vector.load %arg2[%c0_3, %c0_4] : memref<1x16xf32, #tpu.memory_space<vmem>>, vector<1x16xf32>
    %c0_5 = arith.constant 0 : index
    %c0_6 = arith.constant 0 : index
    %3 = vector.load %arg3[%c0_5, %c0_6] : memref<2x16xbf16, #tpu.memory_space<vmem>>, vector<2x16xbf16>
    %c0_7 = arith.constant 0 : index
    %c0_8 = arith.constant 0 : index
    %c0_9 = arith.constant 0 : index
    %4 = vector.load %arg4[%c0_7, %c0_8, %c0_9] : memref<2x32x96xbf16, #tpu.memory_space<vmem>>, vector<2x32x96xbf16>
    %c0_10 = arith.constant 0 : index
    %c0_11 = arith.constant 0 : index
    %c0_12 = arith.constant 0 : index
    %5 = vector.load %arg5[%c0_10, %c0_11, %c0_12] : memref<2x1x96xf32, #tpu.memory_space<vmem>>, vector<2x1x96xf32>
    %c0_13 = arith.constant 0 : index
    %c0_14 = arith.constant 0 : index
    %c0_15 = arith.constant 0 : index
    %6 = vector.load %arg6[%c0_13, %c0_14, %c0_15] : memref<2x32x32xbf16, #tpu.memory_space<vmem>>, vector<2x32x32xbf16>
    %c0_16 = arith.constant 0 : index
    %c0_17 = arith.constant 0 : index
    %c0_18 = arith.constant 0 : index
    %7 = vector.load %arg7[%c0_16, %c0_17, %c0_18] : memref<2x1x32xf32, #tpu.memory_space<vmem>>, vector<2x1x32xf32>
    %c0_19 = arith.constant 0 : index
    %c0_20 = arith.constant 0 : index
    %c0_21 = arith.constant 0 : index
    %8 = vector.load %arg8[%c0_19, %c0_20, %c0_21] : memref<2x1x32xf32, #tpu.memory_space<vmem>>, vector<2x1x32xf32>
    %c0_22 = arith.constant 0 : index
    %c0_23 = arith.constant 0 : index
    %c0_24 = arith.constant 0 : index
    %9 = vector.load %arg9[%c0_22, %c0_23, %c0_24] : memref<2x1x32xf32, #tpu.memory_space<vmem>>, vector<2x1x32xf32>
    %c0_25 = arith.constant 0 : index
    %c0_26 = arith.constant 0 : index
    %c0_27 = arith.constant 0 : index
    %10 = vector.load %arg10[%c0_25, %c0_26, %c0_27] : memref<2x32x64xbf16, #tpu.memory_space<vmem>>, vector<2x32x64xbf16>
    %c0_28 = arith.constant 0 : index
    %c0_29 = arith.constant 0 : index
    %c0_30 = arith.constant 0 : index
    %11 = vector.load %arg11[%c0_28, %c0_29, %c0_30] : memref<2x1x64xf32, #tpu.memory_space<vmem>>, vector<2x1x64xf32>
    %c0_31 = arith.constant 0 : index
    %c0_32 = arith.constant 0 : index
    %c0_33 = arith.constant 0 : index
    %12 = vector.load %arg12[%c0_31, %c0_32, %c0_33] : memref<2x64x32xbf16, #tpu.memory_space<vmem>>, vector<2x64x32xbf16>
    %c0_34 = arith.constant 0 : index
    %c0_35 = arith.constant 0 : index
    %c0_36 = arith.constant 0 : index
    %13 = vector.load %arg13[%c0_34, %c0_35, %c0_36] : memref<2x1x32xf32, #tpu.memory_space<vmem>>, vector<2x1x32xf32>
    %c0_37 = arith.constant 0 : index
    %c0_38 = arith.constant 0 : index
    %c0_39 = arith.constant 0 : index
    %14 = vector.load %arg14[%c0_37, %c0_38, %c0_39] : memref<2x1x32xf32, #tpu.memory_space<vmem>>, vector<2x1x32xf32>
    %c0_40 = arith.constant 0 : index
    %c0_41 = arith.constant 0 : index
    %c0_42 = arith.constant 0 : index
    %15 = vector.load %arg15[%c0_40, %c0_41, %c0_42] : memref<2x1x32xf32, #tpu.memory_space<vmem>>, vector<2x1x32xf32>
    %c0_43 = arith.constant 0 : index
    %c0_44 = arith.constant 0 : index
    %16 = vector.load %arg16[%c0_43, %c0_44] : memref<32x128xbf16, #tpu.memory_space<vmem>>, vector<32x128xbf16>
    %c0_45 = arith.constant 0 : index
    %c0_46 = arith.constant 0 : index
    %17 = vector.load %arg17[%c0_45, %c0_46] : memref<1x128xf32, #tpu.memory_space<vmem>>, vector<1x128xf32>
    %18 = vector.broadcast %1 : vector<16x1xf32> to vector<16x16xf32>
    %19 = vector.broadcast %2 : vector<1x16xf32> to vector<16x16xf32>
    %20 = arith.cmpf oeq, %18, %19 : vector<16x16xf32>
    %cst = arith.constant 0.000000e+00 : f32
    %cst_47 = arith.constant -1.000000e+30 : f32
    %21 = vector.broadcast %cst : f32 to vector<16x16xf32>
    %22 = vector.broadcast %cst_47 : f32 to vector<16x16xf32>
    %23 = arith.select %20, %21, %22 : vector<16x16xi1>, vector<16x16xf32>
    %24 = vector.extract_strided_slice %4 {offsets = [0, 0, 0], sizes = [1, 32, 96], strides = [1, 1, 1]} : vector<2x32x96xbf16> to vector<1x32x96xbf16>
    %25 = vector.shape_cast %24 : vector<1x32x96xbf16> to vector<32x96xbf16>
    %26 = arith.truncf %0 : vector<16x32xf32> to vector<16x32xbf16>
    %cst_48 = arith.constant dense<0.000000e+00> : vector<16x96xf32>
    %27 = tpu.matmul %26, %25, %cst_48 {dimension_numbers = #tpu.dot_dimension_numbers<[1], [0], [0], [1], [0, 0, 1, 1], [], []>} : vector<16x32xbf16>, vector<32x96xbf16>, vector<16x96xf32> -> vector<16x96xf32>
    %28 = vector.extract_strided_slice %5 {offsets = [0, 0, 0], sizes = [1, 1, 96], strides = [1, 1, 1]} : vector<2x1x96xf32> to vector<1x1x96xf32>
    %29 = vector.shape_cast %28 : vector<1x1x96xf32> to vector<1x96xf32>
    %30 = vector.broadcast %29 : vector<1x96xf32> to vector<16x96xf32>
    %31 = arith.addf %27, %30 : vector<16x96xf32>
    %32 = vector.extract_strided_slice %31 {offsets = [0, 0], sizes = [16, 8], strides = [1, 1]} : vector<16x96xf32> to vector<16x8xf32>
    %33 = vector.extract_strided_slice %31 {offsets = [0, 8], sizes = [16, 8], strides = [1, 1]} : vector<16x96xf32> to vector<16x8xf32>
    %34 = vector.extract_strided_slice %31 {offsets = [0, 16], sizes = [16, 8], strides = [1, 1]} : vector<16x96xf32> to vector<16x8xf32>
    %35 = vector.extract_strided_slice %31 {offsets = [0, 24], sizes = [16, 8], strides = [1, 1]} : vector<16x96xf32> to vector<16x8xf32>
    %36 = vector.shape_cast %32 : vector<16x8xf32> to vector<1x16x8xf32>
    %37 = vector.shape_cast %33 : vector<16x8xf32> to vector<1x16x8xf32>
    %38 = vector.shape_cast %34 : vector<16x8xf32> to vector<1x16x8xf32>
    %39 = vector.shape_cast %35 : vector<16x8xf32> to vector<1x16x8xf32>
    %40 = tpu.concatenate %36, %37, %38, %39 in 0 : vector<1x16x8xf32>, vector<1x16x8xf32>, vector<1x16x8xf32>, vector<1x16x8xf32> -> vector<4x16x8xf32>
    %41 = arith.truncf %40 : vector<4x16x8xf32> to vector<4x16x8xbf16>
    %42 = vector.extract_strided_slice %31 {offsets = [0, 32], sizes = [16, 8], strides = [1, 1]} : vector<16x96xf32> to vector<16x8xf32>
    %43 = vector.extract_strided_slice %31 {offsets = [0, 40], sizes = [16, 8], strides = [1, 1]} : vector<16x96xf32> to vector<16x8xf32>
    %44 = vector.extract_strided_slice %31 {offsets = [0, 48], sizes = [16, 8], strides = [1, 1]} : vector<16x96xf32> to vector<16x8xf32>
    %45 = vector.extract_strided_slice %31 {offsets = [0, 56], sizes = [16, 8], strides = [1, 1]} : vector<16x96xf32> to vector<16x8xf32>
    %46 = vector.shape_cast %42 : vector<16x8xf32> to vector<1x16x8xf32>
    %47 = vector.shape_cast %43 : vector<16x8xf32> to vector<1x16x8xf32>
    %48 = vector.shape_cast %44 : vector<16x8xf32> to vector<1x16x8xf32>
    %49 = vector.shape_cast %45 : vector<16x8xf32> to vector<1x16x8xf32>
    %50 = tpu.concatenate %46, %47, %48, %49 in 0 : vector<1x16x8xf32>, vector<1x16x8xf32>, vector<1x16x8xf32>, vector<1x16x8xf32> -> vector<4x16x8xf32>
    %51 = arith.truncf %50 : vector<4x16x8xf32> to vector<4x16x8xbf16>
    %52 = vector.extract_strided_slice %31 {offsets = [0, 64], sizes = [16, 8], strides = [1, 1]} : vector<16x96xf32> to vector<16x8xf32>
    %53 = vector.extract_strided_slice %31 {offsets = [0, 72], sizes = [16, 8], strides = [1, 1]} : vector<16x96xf32> to vector<16x8xf32>
    %54 = vector.extract_strided_slice %31 {offsets = [0, 80], sizes = [16, 8], strides = [1, 1]} : vector<16x96xf32> to vector<16x8xf32>
    %55 = vector.extract_strided_slice %31 {offsets = [0, 88], sizes = [16, 8], strides = [1, 1]} : vector<16x96xf32> to vector<16x8xf32>
    %56 = vector.shape_cast %52 : vector<16x8xf32> to vector<1x16x8xf32>
    %57 = vector.shape_cast %53 : vector<16x8xf32> to vector<1x16x8xf32>
    %58 = vector.shape_cast %54 : vector<16x8xf32> to vector<1x16x8xf32>
    %59 = vector.shape_cast %55 : vector<16x8xf32> to vector<1x16x8xf32>
    %60 = tpu.concatenate %56, %57, %58, %59 in 0 : vector<1x16x8xf32>, vector<1x16x8xf32>, vector<1x16x8xf32>, vector<1x16x8xf32> -> vector<4x16x8xf32>
    %61 = arith.truncf %60 : vector<4x16x8xf32> to vector<4x16x8xbf16>
    "tpu.trace_start"() <{level = 10 : i32, message = "hne,hme->hnm"}> : () -> ()
    %cst_49 = arith.constant dense<0.000000e+00> : vector<4x16x16xf32>
    %62 = tpu.matmul %41, %51, %cst_49 {dimension_numbers = #tpu.dot_dimension_numbers<[2], [2], [1], [1], [0, 0, 0, 1, 1, 1], [0], [0]>} : vector<4x16x8xbf16>, vector<4x16x8xbf16>, vector<4x16x16xf32> -> vector<4x16x16xf32>
    "tpu.trace_stop"() : () -> ()
    %63 = vector.shape_cast %23 : vector<16x16xf32> to vector<1x16x16xf32>
    %64 = vector.broadcast %63 : vector<1x16x16xf32> to vector<4x16x16xf32>
    %65 = arith.addf %62, %64 : vector<4x16x16xf32>
    %cst_50 = arith.constant dense<0xFF800000> : vector<4x16xf32>
    %66 = vector.multi_reduction <maximumf>, %65, %cst_50 [2] : vector<4x16x16xf32> to vector<4x16xf32>
    %67 = vector.shape_cast %66 : vector<4x16xf32> to vector<4x16x1xf32>
    %68 = vector.broadcast %67 : vector<4x16x1xf32> to vector<4x16x16xf32>
    %69 = arith.subf %65, %68 : vector<4x16x16xf32>
    %70 = math.exp %69 : vector<4x16x16xf32>
    %cst_51 = arith.constant dense<0.000000e+00> : vector<4x16xf32>
    %71 = vector.multi_reduction <add>, %70, %cst_51 [2] : vector<4x16x16xf32> to vector<4x16xf32>
    %72 = vector.shape_cast %71 : vector<4x16xf32> to vector<4x16x1xf32>
    %73 = vector.broadcast %72 : vector<4x16x1xf32> to vector<4x16x16xf32>
    %74 = arith.divf %70, %73 : vector<4x16x16xf32>
    %75 = arith.truncf %74 : vector<4x16x16xf32> to vector<4x16x16xbf16>
    "tpu.trace_start"() <{level = 10 : i32, message = "hnm,hme->hne"}> : () -> ()
    %cst_52 = arith.constant dense<0.000000e+00> : vector<4x16x8xf32>
    %76 = tpu.matmul %75, %61, %cst_52 {dimension_numbers = #tpu.dot_dimension_numbers<[2], [1], [1], [2], [0, 0, 0, 1, 1, 2], [0], [0]>} : vector<4x16x16xbf16>, vector<4x16x8xbf16>, vector<4x16x8xf32> -> vector<4x16x8xf32>
    "tpu.trace_stop"() : () -> ()
    %77 = vector.extract_strided_slice %76 {offsets = [0, 0, 0], sizes = [1, 16, 8], strides = [1, 1, 1]} : vector<4x16x8xf32> to vector<1x16x8xf32>
    %78 = vector.shape_cast %77 : vector<1x16x8xf32> to vector<16x8xf32>
    %79 = vector.extract_strided_slice %76 {offsets = [1, 0, 0], sizes = [1, 16, 8], strides = [1, 1, 1]} : vector<4x16x8xf32> to vector<1x16x8xf32>
    %80 = vector.shape_cast %79 : vector<1x16x8xf32> to vector<16x8xf32>
    %81 = vector.extract_strided_slice %76 {offsets = [2, 0, 0], sizes = [1, 16, 8], strides = [1, 1, 1]} : vector<4x16x8xf32> to vector<1x16x8xf32>
    %82 = vector.shape_cast %81 : vector<1x16x8xf32> to vector<16x8xf32>
    %83 = vector.extract_strided_slice %76 {offsets = [3, 0, 0], sizes = [1, 16, 8], strides = [1, 1, 1]} : vector<4x16x8xf32> to vector<1x16x8xf32>
    %84 = vector.shape_cast %83 : vector<1x16x8xf32> to vector<16x8xf32>
    %85 = tpu.concatenate %78, %80, %82, %84 in 1 : vector<16x8xf32>, vector<16x8xf32>, vector<16x8xf32>, vector<16x8xf32> -> vector<16x32xf32>
    %86 = vector.extract_strided_slice %6 {offsets = [0, 0, 0], sizes = [1, 32, 32], strides = [1, 1, 1]} : vector<2x32x32xbf16> to vector<1x32x32xbf16>
    %87 = vector.shape_cast %86 : vector<1x32x32xbf16> to vector<32x32xbf16>
    %88 = arith.truncf %85 : vector<16x32xf32> to vector<16x32xbf16>
    %cst_53 = arith.constant dense<0.000000e+00> : vector<16x32xf32>
    %89 = tpu.matmul %88, %87, %cst_53 {dimension_numbers = #tpu.dot_dimension_numbers<[1], [0], [0], [1], [0, 0, 1, 1], [], []>} : vector<16x32xbf16>, vector<32x32xbf16>, vector<16x32xf32> -> vector<16x32xf32>
    %90 = vector.extract_strided_slice %7 {offsets = [0, 0, 0], sizes = [1, 1, 32], strides = [1, 1, 1]} : vector<2x1x32xf32> to vector<1x1x32xf32>
    %91 = vector.shape_cast %90 : vector<1x1x32xf32> to vector<1x32xf32>
    %92 = vector.broadcast %91 : vector<1x32xf32> to vector<16x32xf32>
    %93 = arith.addf %89, %92 : vector<16x32xf32>
    %94 = arith.addf %0, %93 : vector<16x32xf32>
    %95 = vector.extract_strided_slice %8 {offsets = [0, 0, 0], sizes = [1, 1, 32], strides = [1, 1, 1]} : vector<2x1x32xf32> to vector<1x1x32xf32>
    %96 = vector.shape_cast %95 : vector<1x1x32xf32> to vector<1x32xf32>
    %97 = vector.extract_strided_slice %9 {offsets = [0, 0, 0], sizes = [1, 1, 32], strides = [1, 1, 1]} : vector<2x1x32xf32> to vector<1x1x32xf32>
    %98 = vector.shape_cast %97 : vector<1x1x32xf32> to vector<1x32xf32>
    %cst_54 = arith.constant dense<0.000000e+00> : vector<16xf32>
    %99 = vector.multi_reduction <add>, %94, %cst_54 [1] : vector<16x32xf32> to vector<16xf32>
    %100 = vector.shape_cast %99 : vector<16xf32> to vector<16x1xf32>
    %cst_55 = arith.constant 3.200000e+01 : f32
    %101 = vector.broadcast %cst_55 : f32 to vector<16x1xf32>
    %102 = arith.divf %100, %101 : vector<16x1xf32>
    %103 = vector.broadcast %102 : vector<16x1xf32> to vector<16x32xf32>
    %104 = arith.subf %94, %103 : vector<16x32xf32>
    %105 = arith.mulf %104, %104 : vector<16x32xf32>
    %cst_56 = arith.constant dense<0.000000e+00> : vector<16xf32>
    %106 = vector.multi_reduction <add>, %105, %cst_56 [1] : vector<16x32xf32> to vector<16xf32>
    %107 = vector.shape_cast %106 : vector<16xf32> to vector<16x1xf32>
    %cst_57 = arith.constant 3.200000e+01 : f32
    %108 = vector.broadcast %cst_57 : f32 to vector<16x1xf32>
    %109 = arith.divf %107, %108 : vector<16x1xf32>
    %cst_58 = arith.constant 9.99999974E-6 : f32
    %110 = vector.broadcast %cst_58 : f32 to vector<16x1xf32>
    %111 = arith.addf %109, %110 : vector<16x1xf32>
    %112 = math.rsqrt %111 : vector<16x1xf32>
    %113 = vector.broadcast %112 : vector<16x1xf32> to vector<16x32xf32>
    %114 = arith.mulf %104, %113 : vector<16x32xf32>
    %115 = vector.broadcast %96 : vector<1x32xf32> to vector<16x32xf32>
    %116 = arith.mulf %114, %115 : vector<16x32xf32>
    %117 = vector.broadcast %98 : vector<1x32xf32> to vector<16x32xf32>
    %118 = arith.addf %116, %117 : vector<16x32xf32>
    %119 = vector.extract_strided_slice %10 {offsets = [0, 0, 0], sizes = [1, 32, 64], strides = [1, 1, 1]} : vector<2x32x64xbf16> to vector<1x32x64xbf16>
    %120 = vector.shape_cast %119 : vector<1x32x64xbf16> to vector<32x64xbf16>
    %121 = arith.truncf %118 : vector<16x32xf32> to vector<16x32xbf16>
    %cst_59 = arith.constant dense<0.000000e+00> : vector<16x64xf32>
    %122 = tpu.matmul %121, %120, %cst_59 {dimension_numbers = #tpu.dot_dimension_numbers<[1], [0], [0], [1], [0, 0, 1, 1], [], []>} : vector<16x32xbf16>, vector<32x64xbf16>, vector<16x64xf32> -> vector<16x64xf32>
    %123 = vector.extract_strided_slice %11 {offsets = [0, 0, 0], sizes = [1, 1, 64], strides = [1, 1, 1]} : vector<2x1x64xf32> to vector<1x1x64xf32>
    %124 = vector.shape_cast %123 : vector<1x1x64xf32> to vector<1x64xf32>
    %125 = vector.broadcast %124 : vector<1x64xf32> to vector<16x64xf32>
    %126 = arith.addf %122, %125 : vector<16x64xf32>
    %cst_60 = arith.constant 0.000000e+00 : f32
    %127 = vector.broadcast %cst_60 : f32 to vector<16x64xf32>
    %128 = arith.maximumf %126, %127 : vector<16x64xf32>
    %129 = vector.extract_strided_slice %12 {offsets = [0, 0, 0], sizes = [1, 64, 32], strides = [1, 1, 1]} : vector<2x64x32xbf16> to vector<1x64x32xbf16>
    %130 = vector.shape_cast %129 : vector<1x64x32xbf16> to vector<64x32xbf16>
    %131 = arith.truncf %128 : vector<16x64xf32> to vector<16x64xbf16>
    %cst_61 = arith.constant dense<0.000000e+00> : vector<16x32xf32>
    %132 = tpu.matmul %131, %130, %cst_61 {dimension_numbers = #tpu.dot_dimension_numbers<[1], [0], [0], [1], [0, 0, 1, 1], [], []>} : vector<16x64xbf16>, vector<64x32xbf16>, vector<16x32xf32> -> vector<16x32xf32>
    %133 = vector.extract_strided_slice %13 {offsets = [0, 0, 0], sizes = [1, 1, 32], strides = [1, 1, 1]} : vector<2x1x32xf32> to vector<1x1x32xf32>
    %134 = vector.shape_cast %133 : vector<1x1x32xf32> to vector<1x32xf32>
    %135 = vector.broadcast %134 : vector<1x32xf32> to vector<16x32xf32>
    %136 = arith.addf %132, %135 : vector<16x32xf32>
    %137 = arith.addf %118, %136 : vector<16x32xf32>
    %138 = vector.extract_strided_slice %14 {offsets = [0, 0, 0], sizes = [1, 1, 32], strides = [1, 1, 1]} : vector<2x1x32xf32> to vector<1x1x32xf32>
    %139 = vector.shape_cast %138 : vector<1x1x32xf32> to vector<1x32xf32>
    %140 = vector.extract_strided_slice %15 {offsets = [0, 0, 0], sizes = [1, 1, 32], strides = [1, 1, 1]} : vector<2x1x32xf32> to vector<1x1x32xf32>
    %141 = vector.shape_cast %140 : vector<1x1x32xf32> to vector<1x32xf32>
    %cst_62 = arith.constant dense<0.000000e+00> : vector<16xf32>
    %142 = vector.multi_reduction <add>, %137, %cst_62 [1] : vector<16x32xf32> to vector<16xf32>
    %143 = vector.shape_cast %142 : vector<16xf32> to vector<16x1xf32>
    %cst_63 = arith.constant 3.200000e+01 : f32
    %144 = vector.broadcast %cst_63 : f32 to vector<16x1xf32>
    %145 = arith.divf %143, %144 : vector<16x1xf32>
    %146 = vector.broadcast %145 : vector<16x1xf32> to vector<16x32xf32>
    %147 = arith.subf %137, %146 : vector<16x32xf32>
    %148 = arith.mulf %147, %147 : vector<16x32xf32>
    %cst_64 = arith.constant dense<0.000000e+00> : vector<16xf32>
    %149 = vector.multi_reduction <add>, %148, %cst_64 [1] : vector<16x32xf32> to vector<16xf32>
    %150 = vector.shape_cast %149 : vector<16xf32> to vector<16x1xf32>
    %cst_65 = arith.constant 3.200000e+01 : f32
    %151 = vector.broadcast %cst_65 : f32 to vector<16x1xf32>
    %152 = arith.divf %150, %151 : vector<16x1xf32>
    %cst_66 = arith.constant 9.99999974E-6 : f32
    %153 = vector.broadcast %cst_66 : f32 to vector<16x1xf32>
    %154 = arith.addf %152, %153 : vector<16x1xf32>
    %155 = math.rsqrt %154 : vector<16x1xf32>
    %156 = vector.broadcast %155 : vector<16x1xf32> to vector<16x32xf32>
    %157 = arith.mulf %147, %156 : vector<16x32xf32>
    %158 = vector.broadcast %139 : vector<1x32xf32> to vector<16x32xf32>
    %159 = arith.mulf %157, %158 : vector<16x32xf32>
    %160 = vector.broadcast %141 : vector<1x32xf32> to vector<16x32xf32>
    %161 = arith.addf %159, %160 : vector<16x32xf32>
    %162 = vector.extract_strided_slice %4 {offsets = [1, 0, 0], sizes = [1, 32, 96], strides = [1, 1, 1]} : vector<2x32x96xbf16> to vector<1x32x96xbf16>
    %163 = vector.shape_cast %162 : vector<1x32x96xbf16> to vector<32x96xbf16>
    %164 = arith.truncf %161 : vector<16x32xf32> to vector<16x32xbf16>
    %cst_67 = arith.constant dense<0.000000e+00> : vector<16x96xf32>
    %165 = tpu.matmul %164, %163, %cst_67 {dimension_numbers = #tpu.dot_dimension_numbers<[1], [0], [0], [1], [0, 0, 1, 1], [], []>} : vector<16x32xbf16>, vector<32x96xbf16>, vector<16x96xf32> -> vector<16x96xf32>
    %166 = vector.extract_strided_slice %5 {offsets = [1, 0, 0], sizes = [1, 1, 96], strides = [1, 1, 1]} : vector<2x1x96xf32> to vector<1x1x96xf32>
    %167 = vector.shape_cast %166 : vector<1x1x96xf32> to vector<1x96xf32>
    %168 = vector.broadcast %167 : vector<1x96xf32> to vector<16x96xf32>
    %169 = arith.addf %165, %168 : vector<16x96xf32>
    %170 = vector.extract_strided_slice %169 {offsets = [0, 0], sizes = [16, 8], strides = [1, 1]} : vector<16x96xf32> to vector<16x8xf32>
    %171 = vector.extract_strided_slice %169 {offsets = [0, 8], sizes = [16, 8], strides = [1, 1]} : vector<16x96xf32> to vector<16x8xf32>
    %172 = vector.extract_strided_slice %169 {offsets = [0, 16], sizes = [16, 8], strides = [1, 1]} : vector<16x96xf32> to vector<16x8xf32>
    %173 = vector.extract_strided_slice %169 {offsets = [0, 24], sizes = [16, 8], strides = [1, 1]} : vector<16x96xf32> to vector<16x8xf32>
    %174 = vector.shape_cast %170 : vector<16x8xf32> to vector<1x16x8xf32>
    %175 = vector.shape_cast %171 : vector<16x8xf32> to vector<1x16x8xf32>
    %176 = vector.shape_cast %172 : vector<16x8xf32> to vector<1x16x8xf32>
    %177 = vector.shape_cast %173 : vector<16x8xf32> to vector<1x16x8xf32>
    %178 = tpu.concatenate %174, %175, %176, %177 in 0 : vector<1x16x8xf32>, vector<1x16x8xf32>, vector<1x16x8xf32>, vector<1x16x8xf32> -> vector<4x16x8xf32>
    %179 = arith.truncf %178 : vector<4x16x8xf32> to vector<4x16x8xbf16>
    %180 = vector.extract_strided_slice %169 {offsets = [0, 32], sizes = [16, 8], strides = [1, 1]} : vector<16x96xf32> to vector<16x8xf32>
    %181 = vector.extract_strided_slice %169 {offsets = [0, 40], sizes = [16, 8], strides = [1, 1]} : vector<16x96xf32> to vector<16x8xf32>
    %182 = vector.extract_strided_slice %169 {offsets = [0, 48], sizes = [16, 8], strides = [1, 1]} : vector<16x96xf32> to vector<16x8xf32>
    %183 = vector.extract_strided_slice %169 {offsets = [0, 56], sizes = [16, 8], strides = [1, 1]} : vector<16x96xf32> to vector<16x8xf32>
    %184 = vector.shape_cast %180 : vector<16x8xf32> to vector<1x16x8xf32>
    %185 = vector.shape_cast %181 : vector<16x8xf32> to vector<1x16x8xf32>
    %186 = vector.shape_cast %182 : vector<16x8xf32> to vector<1x16x8xf32>
    %187 = vector.shape_cast %183 : vector<16x8xf32> to vector<1x16x8xf32>
    %188 = tpu.concatenate %184, %185, %186, %187 in 0 : vector<1x16x8xf32>, vector<1x16x8xf32>, vector<1x16x8xf32>, vector<1x16x8xf32> -> vector<4x16x8xf32>
    %189 = arith.truncf %188 : vector<4x16x8xf32> to vector<4x16x8xbf16>
    %190 = vector.extract_strided_slice %169 {offsets = [0, 64], sizes = [16, 8], strides = [1, 1]} : vector<16x96xf32> to vector<16x8xf32>
    %191 = vector.extract_strided_slice %169 {offsets = [0, 72], sizes = [16, 8], strides = [1, 1]} : vector<16x96xf32> to vector<16x8xf32>
    %192 = vector.extract_strided_slice %169 {offsets = [0, 80], sizes = [16, 8], strides = [1, 1]} : vector<16x96xf32> to vector<16x8xf32>
    %193 = vector.extract_strided_slice %169 {offsets = [0, 88], sizes = [16, 8], strides = [1, 1]} : vector<16x96xf32> to vector<16x8xf32>
    %194 = vector.shape_cast %190 : vector<16x8xf32> to vector<1x16x8xf32>
    %195 = vector.shape_cast %191 : vector<16x8xf32> to vector<1x16x8xf32>
    %196 = vector.shape_cast %192 : vector<16x8xf32> to vector<1x16x8xf32>
    %197 = vector.shape_cast %193 : vector<16x8xf32> to vector<1x16x8xf32>
    %198 = tpu.concatenate %194, %195, %196, %197 in 0 : vector<1x16x8xf32>, vector<1x16x8xf32>, vector<1x16x8xf32>, vector<1x16x8xf32> -> vector<4x16x8xf32>
    %199 = arith.truncf %198 : vector<4x16x8xf32> to vector<4x16x8xbf16>
    "tpu.trace_start"() <{level = 10 : i32, message = "hne,hme->hnm"}> : () -> ()
    %cst_68 = arith.constant dense<0.000000e+00> : vector<4x16x16xf32>
    %200 = tpu.matmul %179, %189, %cst_68 {dimension_numbers = #tpu.dot_dimension_numbers<[2], [2], [1], [1], [0, 0, 0, 1, 1, 1], [0], [0]>} : vector<4x16x8xbf16>, vector<4x16x8xbf16>, vector<4x16x16xf32> -> vector<4x16x16xf32>
    "tpu.trace_stop"() : () -> ()
    %201 = vector.shape_cast %23 : vector<16x16xf32> to vector<1x16x16xf32>
    %202 = vector.broadcast %201 : vector<1x16x16xf32> to vector<4x16x16xf32>
    %203 = arith.addf %200, %202 : vector<4x16x16xf32>
    %cst_69 = arith.constant dense<0xFF800000> : vector<4x16xf32>
    %204 = vector.multi_reduction <maximumf>, %203, %cst_69 [2] : vector<4x16x16xf32> to vector<4x16xf32>
    %205 = vector.shape_cast %204 : vector<4x16xf32> to vector<4x16x1xf32>
    %206 = vector.broadcast %205 : vector<4x16x1xf32> to vector<4x16x16xf32>
    %207 = arith.subf %203, %206 : vector<4x16x16xf32>
    %208 = math.exp %207 : vector<4x16x16xf32>
    %cst_70 = arith.constant dense<0.000000e+00> : vector<4x16xf32>
    %209 = vector.multi_reduction <add>, %208, %cst_70 [2] : vector<4x16x16xf32> to vector<4x16xf32>
    %210 = vector.shape_cast %209 : vector<4x16xf32> to vector<4x16x1xf32>
    %211 = vector.broadcast %210 : vector<4x16x1xf32> to vector<4x16x16xf32>
    %212 = arith.divf %208, %211 : vector<4x16x16xf32>
    %213 = arith.truncf %212 : vector<4x16x16xf32> to vector<4x16x16xbf16>
    "tpu.trace_start"() <{level = 10 : i32, message = "hnm,hme->hne"}> : () -> ()
    %cst_71 = arith.constant dense<0.000000e+00> : vector<4x16x8xf32>
    %214 = tpu.matmul %213, %199, %cst_71 {dimension_numbers = #tpu.dot_dimension_numbers<[2], [1], [1], [2], [0, 0, 0, 1, 1, 2], [0], [0]>} : vector<4x16x16xbf16>, vector<4x16x8xbf16>, vector<4x16x8xf32> -> vector<4x16x8xf32>
    "tpu.trace_stop"() : () -> ()
    %215 = vector.extract_strided_slice %214 {offsets = [0, 0, 0], sizes = [1, 16, 8], strides = [1, 1, 1]} : vector<4x16x8xf32> to vector<1x16x8xf32>
    %216 = vector.shape_cast %215 : vector<1x16x8xf32> to vector<16x8xf32>
    %217 = vector.extract_strided_slice %214 {offsets = [1, 0, 0], sizes = [1, 16, 8], strides = [1, 1, 1]} : vector<4x16x8xf32> to vector<1x16x8xf32>
    %218 = vector.shape_cast %217 : vector<1x16x8xf32> to vector<16x8xf32>
    %219 = vector.extract_strided_slice %214 {offsets = [2, 0, 0], sizes = [1, 16, 8], strides = [1, 1, 1]} : vector<4x16x8xf32> to vector<1x16x8xf32>
    %220 = vector.shape_cast %219 : vector<1x16x8xf32> to vector<16x8xf32>
    %221 = vector.extract_strided_slice %214 {offsets = [3, 0, 0], sizes = [1, 16, 8], strides = [1, 1, 1]} : vector<4x16x8xf32> to vector<1x16x8xf32>
    %222 = vector.shape_cast %221 : vector<1x16x8xf32> to vector<16x8xf32>
    %223 = tpu.concatenate %216, %218, %220, %222 in 1 : vector<16x8xf32>, vector<16x8xf32>, vector<16x8xf32>, vector<16x8xf32> -> vector<16x32xf32>
    %224 = vector.extract_strided_slice %6 {offsets = [1, 0, 0], sizes = [1, 32, 32], strides = [1, 1, 1]} : vector<2x32x32xbf16> to vector<1x32x32xbf16>
    %225 = vector.shape_cast %224 : vector<1x32x32xbf16> to vector<32x32xbf16>
    %226 = arith.truncf %223 : vector<16x32xf32> to vector<16x32xbf16>
    %cst_72 = arith.constant dense<0.000000e+00> : vector<16x32xf32>
    %227 = tpu.matmul %226, %225, %cst_72 {dimension_numbers = #tpu.dot_dimension_numbers<[1], [0], [0], [1], [0, 0, 1, 1], [], []>} : vector<16x32xbf16>, vector<32x32xbf16>, vector<16x32xf32> -> vector<16x32xf32>
    %228 = vector.extract_strided_slice %7 {offsets = [1, 0, 0], sizes = [1, 1, 32], strides = [1, 1, 1]} : vector<2x1x32xf32> to vector<1x1x32xf32>
    %229 = vector.shape_cast %228 : vector<1x1x32xf32> to vector<1x32xf32>
    %230 = vector.broadcast %229 : vector<1x32xf32> to vector<16x32xf32>
    %231 = arith.addf %227, %230 : vector<16x32xf32>
    %232 = arith.addf %161, %231 : vector<16x32xf32>
    %233 = vector.extract_strided_slice %8 {offsets = [1, 0, 0], sizes = [1, 1, 32], strides = [1, 1, 1]} : vector<2x1x32xf32> to vector<1x1x32xf32>
    %234 = vector.shape_cast %233 : vector<1x1x32xf32> to vector<1x32xf32>
    %235 = vector.extract_strided_slice %9 {offsets = [1, 0, 0], sizes = [1, 1, 32], strides = [1, 1, 1]} : vector<2x1x32xf32> to vector<1x1x32xf32>
    %236 = vector.shape_cast %235 : vector<1x1x32xf32> to vector<1x32xf32>
    %cst_73 = arith.constant dense<0.000000e+00> : vector<16xf32>
    %237 = vector.multi_reduction <add>, %232, %cst_73 [1] : vector<16x32xf32> to vector<16xf32>
    %238 = vector.shape_cast %237 : vector<16xf32> to vector<16x1xf32>
    %cst_74 = arith.constant 3.200000e+01 : f32
    %239 = vector.broadcast %cst_74 : f32 to vector<16x1xf32>
    %240 = arith.divf %238, %239 : vector<16x1xf32>
    %241 = vector.broadcast %240 : vector<16x1xf32> to vector<16x32xf32>
    %242 = arith.subf %232, %241 : vector<16x32xf32>
    %243 = arith.mulf %242, %242 : vector<16x32xf32>
    %cst_75 = arith.constant dense<0.000000e+00> : vector<16xf32>
    %244 = vector.multi_reduction <add>, %243, %cst_75 [1] : vector<16x32xf32> to vector<16xf32>
    %245 = vector.shape_cast %244 : vector<16xf32> to vector<16x1xf32>
    %cst_76 = arith.constant 3.200000e+01 : f32
    %246 = vector.broadcast %cst_76 : f32 to vector<16x1xf32>
    %247 = arith.divf %245, %246 : vector<16x1xf32>
    %cst_77 = arith.constant 9.99999974E-6 : f32
    %248 = vector.broadcast %cst_77 : f32 to vector<16x1xf32>
    %249 = arith.addf %247, %248 : vector<16x1xf32>
    %250 = math.rsqrt %249 : vector<16x1xf32>
    %251 = vector.broadcast %250 : vector<16x1xf32> to vector<16x32xf32>
    %252 = arith.mulf %242, %251 : vector<16x32xf32>
    %253 = vector.broadcast %234 : vector<1x32xf32> to vector<16x32xf32>
    %254 = arith.mulf %252, %253 : vector<16x32xf32>
    %255 = vector.broadcast %236 : vector<1x32xf32> to vector<16x32xf32>
    %256 = arith.addf %254, %255 : vector<16x32xf32>
    %257 = vector.extract_strided_slice %10 {offsets = [1, 0, 0], sizes = [1, 32, 64], strides = [1, 1, 1]} : vector<2x32x64xbf16> to vector<1x32x64xbf16>
    %258 = vector.shape_cast %257 : vector<1x32x64xbf16> to vector<32x64xbf16>
    %259 = arith.truncf %256 : vector<16x32xf32> to vector<16x32xbf16>
    %cst_78 = arith.constant dense<0.000000e+00> : vector<16x64xf32>
    %260 = tpu.matmul %259, %258, %cst_78 {dimension_numbers = #tpu.dot_dimension_numbers<[1], [0], [0], [1], [0, 0, 1, 1], [], []>} : vector<16x32xbf16>, vector<32x64xbf16>, vector<16x64xf32> -> vector<16x64xf32>
    %261 = vector.extract_strided_slice %11 {offsets = [1, 0, 0], sizes = [1, 1, 64], strides = [1, 1, 1]} : vector<2x1x64xf32> to vector<1x1x64xf32>
    %262 = vector.shape_cast %261 : vector<1x1x64xf32> to vector<1x64xf32>
    %263 = vector.broadcast %262 : vector<1x64xf32> to vector<16x64xf32>
    %264 = arith.addf %260, %263 : vector<16x64xf32>
    %cst_79 = arith.constant 0.000000e+00 : f32
    %265 = vector.broadcast %cst_79 : f32 to vector<16x64xf32>
    %266 = arith.maximumf %264, %265 : vector<16x64xf32>
    %267 = vector.extract_strided_slice %12 {offsets = [1, 0, 0], sizes = [1, 64, 32], strides = [1, 1, 1]} : vector<2x64x32xbf16> to vector<1x64x32xbf16>
    %268 = vector.shape_cast %267 : vector<1x64x32xbf16> to vector<64x32xbf16>
    %269 = arith.truncf %266 : vector<16x64xf32> to vector<16x64xbf16>
    %cst_80 = arith.constant dense<0.000000e+00> : vector<16x32xf32>
    %270 = tpu.matmul %269, %268, %cst_80 {dimension_numbers = #tpu.dot_dimension_numbers<[1], [0], [0], [1], [0, 0, 1, 1], [], []>} : vector<16x64xbf16>, vector<64x32xbf16>, vector<16x32xf32> -> vector<16x32xf32>
    %271 = vector.extract_strided_slice %13 {offsets = [1, 0, 0], sizes = [1, 1, 32], strides = [1, 1, 1]} : vector<2x1x32xf32> to vector<1x1x32xf32>
    %272 = vector.shape_cast %271 : vector<1x1x32xf32> to vector<1x32xf32>
    %273 = vector.broadcast %272 : vector<1x32xf32> to vector<16x32xf32>
    %274 = arith.addf %270, %273 : vector<16x32xf32>
    %275 = arith.addf %256, %274 : vector<16x32xf32>
    %276 = vector.extract_strided_slice %14 {offsets = [1, 0, 0], sizes = [1, 1, 32], strides = [1, 1, 1]} : vector<2x1x32xf32> to vector<1x1x32xf32>
    %277 = vector.shape_cast %276 : vector<1x1x32xf32> to vector<1x32xf32>
    %278 = vector.extract_strided_slice %15 {offsets = [1, 0, 0], sizes = [1, 1, 32], strides = [1, 1, 1]} : vector<2x1x32xf32> to vector<1x1x32xf32>
    %279 = vector.shape_cast %278 : vector<1x1x32xf32> to vector<1x32xf32>
    %cst_81 = arith.constant dense<0.000000e+00> : vector<16xf32>
    %280 = vector.multi_reduction <add>, %275, %cst_81 [1] : vector<16x32xf32> to vector<16xf32>
    %281 = vector.shape_cast %280 : vector<16xf32> to vector<16x1xf32>
    %cst_82 = arith.constant 3.200000e+01 : f32
    %282 = vector.broadcast %cst_82 : f32 to vector<16x1xf32>
    %283 = arith.divf %281, %282 : vector<16x1xf32>
    %284 = vector.broadcast %283 : vector<16x1xf32> to vector<16x32xf32>
    %285 = arith.subf %275, %284 : vector<16x32xf32>
    %286 = arith.mulf %285, %285 : vector<16x32xf32>
    %cst_83 = arith.constant dense<0.000000e+00> : vector<16xf32>
    %287 = vector.multi_reduction <add>, %286, %cst_83 [1] : vector<16x32xf32> to vector<16xf32>
    %288 = vector.shape_cast %287 : vector<16xf32> to vector<16x1xf32>
    %cst_84 = arith.constant 3.200000e+01 : f32
    %289 = vector.broadcast %cst_84 : f32 to vector<16x1xf32>
    %290 = arith.divf %288, %289 : vector<16x1xf32>
    %cst_85 = arith.constant 9.99999974E-6 : f32
    %291 = vector.broadcast %cst_85 : f32 to vector<16x1xf32>
    %292 = arith.addf %290, %291 : vector<16x1xf32>
    %293 = math.rsqrt %292 : vector<16x1xf32>
    %294 = vector.broadcast %293 : vector<16x1xf32> to vector<16x32xf32>
    %295 = arith.mulf %285, %294 : vector<16x32xf32>
    %296 = vector.broadcast %277 : vector<1x32xf32> to vector<16x32xf32>
    %297 = arith.mulf %295, %296 : vector<16x32xf32>
    %298 = vector.broadcast %279 : vector<1x32xf32> to vector<16x32xf32>
    %299 = arith.addf %297, %298 : vector<16x32xf32>
    %300 = arith.truncf %299 : vector<16x32xf32> to vector<16x32xbf16>
    %cst_86 = arith.constant dense<0.000000e+00> : vector<2x32xf32>
    %301 = tpu.matmul %3, %300, %cst_86 {dimension_numbers = #tpu.dot_dimension_numbers<[1], [0], [0], [1], [0, 0, 1, 1], [], []>} : vector<2x16xbf16>, vector<16x32xbf16>, vector<2x32xf32> -> vector<2x32xf32>
    %302 = arith.truncf %301 : vector<2x32xf32> to vector<2x32xbf16>
    %cst_87 = arith.constant dense<0.000000e+00> : vector<2x128xf32>
    %303 = tpu.matmul %302, %16, %cst_87 {dimension_numbers = #tpu.dot_dimension_numbers<[1], [0], [0], [1], [0, 0, 1, 1], [], []>} : vector<2x32xbf16>, vector<32x128xbf16>, vector<2x128xf32> -> vector<2x128xf32>
    %304 = vector.broadcast %17 : vector<1x128xf32> to vector<2x128xf32>
    %305 = arith.addf %303, %304 : vector<2x128xf32>
    %c0_88 = arith.constant 0 : index
    %c0_89 = arith.constant 0 : index
    %306 = vector.load %arg18[%c0_88, %c0_89] : memref<2x128xf32, #tpu.memory_space<vmem>>, vector<2x128xf32>
    tpu.vector_store %arg18[%c0_88, %c0_89], %305 {strides = array<i32>} : memref<2x128xf32, #tpu.memory_space<vmem>>, vector<2x128xf32>,
    return
  }
}

</mosaic_0001>

<bundles_post_ra>
// kernel: tpu_custom_call.1
= control target key start
LH: loop header
LB: loop body
LE: loop exit
PB: predicated region body
PF: predicated region fallthrough
CT: control target
= control target key end

     0   :  { %s3323_s0 = inlined_call_operand.hbm [shape: f32[16,32], index: 0, kind: input, shape index: {}]   ;;  %s3324_s1 = inlined_call_operand.vmem [shape: f32[16,1], index: 1, kind: input, shape index: {}]   ;;  %s3325_s2 = inlined_call_operand.hbm [shape: f32[1,16], index: 2, kind: input, shape index: {}]   ;;  %s3326_s3 = inlined_call_operand.hbm [shape: bf16[2,16], index: 3, kind: input, shape index: {}]   ;;  %s3327_s4 = inlined_call_operand.vmem [shape: bf16[2,32,96], index: 4, kind: input, shape index: {}]   ;;  %s3328_s5 = inlined_call_operand.vmem [shape: f32[2,1,96], index: 5, kind: input, shape index: {}]   ;;  %s3329_s6 = inlined_call_operand.vmem [shape: bf16[2,32,32], index: 6, kind: input, shape index: {}]   ;;  %s3330_s7 = inlined_call_operand.vmem [shape: f32[2,1,32], index: 7, kind: input, shape index: {}]   ;;  %s3331_s8 = inlined_call_operand.vmem [shape: f32[2,1,32], index: 8, kind: input, shape index: {}]   ;;  %s3332_s9 = inlined_call_operand.hbm [shape: f32[2,1,32], index: 9, kind: input, shape index: {}]   ;;  %s3333_s10 = inlined_call_operand.vmem [shape: bf16[2,32,64], index: 10, kind: input, shape index: {}]   ;;  %s3334_s11 = inlined_call_operand.hbm [shape: f32[2,1,64], index: 11, kind: input, shape index: {}]   ;;  %s3335_s12 = inlined_call_operand.vmem [shape: bf16[2,64,32], index: 12, kind: input, shape index: {}]   ;;  %s3336_s13 = inlined_call_operand.vmem [shape: f32[2,1,32], index: 13, kind: input, shape index: {}]   ;;  %s3337_s14 = inlined_call_operand.vmem [shape: f32[2,1,32], index: 14, kind: input, shape index: {}]   ;;  %s3338_s15 = inlined_call_operand.vmem [shape: f32[2,1,32], index: 15, kind: input, shape index: {}]   ;;  %s3339_s16 = inlined_call_operand.hbm [shape: bf16[32,128], index: 16, kind: input, shape index: {}]   ;;  %s3340_s17 = inlined_call_operand.vmem [shape: f32[1,128], index: 17, kind: input, shape index: {}]   ;;  %s3341_s18 = inlined_call_operand.hbm [shape: f32[2,128], index: 18, kind: output, shape index: {}]  }
   0x1   :  { %3343 = sst [smem:[#allocation19_spill]] %s3323_s0 }
   0x2   :  { %3344 = sst [smem:[#allocation20_spill]] %s3324_s1 }
   0x3   :  { %3345 = sst [smem:[#allocation21_spill]] %s3325_s2 }
   0x4   :  { %23 = vsyncpa [#allocation3], 0 }
   0x5   :  { %24 = vsyncpa [#allocation6], 0 }
   0x6   :  { %25 = vsyncpa [#allocation9], 0 }
   0x7   :  { %26 = vsyncpa [#allocation12], 0 }
   0x8   :  { %27 = vsyncpa [#allocation4], 0  ;;  %s2782_s27 = smov [#allocation5]   ;;  %s2783_s29 = smov [#allocation8]  }
   0x9   :  { %s48_s28 = sshll.u32 %s2782_s27, 4  ;;  %s77_s30 = sshll.u32 %s2783_s29, 4  ;;  %s49_s28 = int_to_ptr.vmem [resolvable:$true] %s48_s28  ;;  %s78_s30 = int_to_ptr.vmem [resolvable:$true] %s77_s30 }
   0xa   :  { %s2640_s0 = scalar_lea.vmem %s49_s28, 16  ;;  %s2644_s19 = scalar_lea.vmem %s49_s28, 32 }
   0xb   :  { %p2641_p0 = scmp.ne.s32.totalorder %s49_s28, %s2640_s0  ;;  %p2645_p1 = scmp.lt.s32.totalorder %s49_s28, %s49_s28 }
   0xc   :  { %p2646_p2 = scmp.lt.s32.totalorder %s2644_s19, %s2640_s0 }
   0xe   :  { %p2647_p3 = por %p2646_p2, %p2645_p1 }
  0x10   :  { %p2648_p4 = pnand %p2647_p3, %p2641_p0 }
  0x12   :  { %2651 = shalt.err (!%p2648_p4)
}
  0x13   :  { %s3346_s21 = sld [smem:[#allocation21_spill]]  ;;  %s2660_s22 = scalar_lea.vmem %s78_s30, 32 }
  0x14   :  { %p2661_p5 = scmp.ne.s32.totalorder %s78_s30, %s2660_s22  ;;  %p2665_p6 = scmp.lt.s32.totalorder %s78_s30, %s78_s30 }
  0x15   :  { %p2666_p7 = scmp.lt.s32.totalorder %s2660_s22, %s2660_s22 }
  0x17   :  { %p2667_p8 = por %p2666_p7, %p2665_p6 }
  0x19   :  { %51 = dma.hbm_to_vmem [thread:$0]  %s3346_s21, 16, %s49_s28, [#allocation6]  }
  0x1a   :  { %p2668_p9 = pnand %p2667_p8, %p2661_p5 }
  0x1c   :  { %2671 = shalt.err (!%p2668_p9)
}
  0x1d   :  { %s2784_s2 = smov 16   ;;  %s2785_s23 = smov 1  }
  0x1e   :  { %83 = dma.hbm_to_vmem [thread:$0]  %s3332_s9, 32, %s78_s30, [#allocation9], %s2784_s2, %s2784_s2, %s2785_s23  }
  0x1f   :  { %s2786_s26 = smov [#allocation2]  }
  0x20   :  { %s33_s27 = sshll.u32 %s2786_s26, 4  ;;  %s34_s27 = int_to_ptr.vmem [resolvable:$true] %s33_s27 }
  0x21   :  { %s2680_s28 = scalar_lea.vmem %s34_s27, 256  ;;  %p2685_p11 = scmp.lt.s32.totalorder %s34_s27, %s34_s27 }
  0x22   :  { %p2681_p10 = scmp.ne.s32.totalorder %s34_s27, %s2680_s28  ;;  %p2686_p12 = scmp.lt.s32.totalorder %s2680_s28, %s2680_s28 }
  0x24   :  { %p2687_p13 = por %p2686_p12, %p2685_p11 }
  0x26   :  { %p2688_p0 = pnand %p2687_p13, %p2681_p10 }
  0x28   :  { %2691 = shalt.err (!%p2688_p0)
}
  0x29   :  { %s2787_s29 = smov 128   ;;  %s2788_s0 = smov 8  }
  0x2a   :  { %s3347_s20 = sld [smem:[#allocation19_spill]]  ;;  %s2789_s21 = smov [#allocation7]  }
  0x2b   :  { %s58_s22 = sshll.u32 %s2789_s21, 4  ;;  %s2790_s9 = smov [#allocation10]   ;;  %s59_s22 = int_to_ptr.vmem [resolvable:$true] %s58_s22 }
  0x2c   :  { %s91_s30 = sshll.u32 %s2790_s9, 4  ;;  %s2700_s24 = scalar_lea.vmem %s59_s22, 16  ;;  %s92_s30 = int_to_ptr.vmem [resolvable:$true] %s91_s30 }
  0x2d   :  { %p2701_p1 = scmp.ne.s32.totalorder %s59_s22, %s2700_s24  ;;  %s2704_s25 = scalar_lea.vmem %s59_s22, 32 }
  0x2e   :  { %p2705_p2 = scmp.lt.s32.totalorder %s59_s22, %s59_s22  ;;  %p2706_p3 = scmp.lt.s32.totalorder %s2704_s25, %s2700_s24 }
  0x30   :  { %39 = dma.hbm_to_vmem [thread:$0]  %s3347_s20, 256, %s34_s27, [#allocation3], %s2787_s29, %s2787_s29, %s2788_s0  }
  0x31   :  { %p2707_p4 = por %p2706_p3, %p2705_p2 }
  0x33   :  { %p2708_p5 = pnand %p2707_p4, %p2701_p1 }
  0x35   :  { %2711 = shalt.err (!%p2708_p5)
}
  0x36   :  { %61 = dma.hbm_to_vmem [thread:$0]  %s3326_s3, 16, %s59_s22, [#allocation6]  }
  0x37   :  { %s2720_s19 = scalar_lea.vmem %s92_s30, 32  ;;  %p2725_p7 = scmp.lt.s32.totalorder %s92_s30, %s92_s30 }
  0x38   :  { %p2721_p6 = scmp.ne.s32.totalorder %s92_s30, %s2720_s19  ;;  %p2726_p8 = scmp.lt.s32.totalorder %s2720_s19, %s2720_s19 }
  0x3a   :  { %p2727_p9 = por %p2726_p8, %p2725_p7 }
  0x3c   :  { %p2728_p10 = pnand %p2727_p9, %p2721_p6 }
  0x3e   :  { %2731 = shalt.err (!%p2728_p10)
}
  0x3f   :  { %97 = dma.hbm_to_vmem [thread:$0]  %s3334_s11, 32, %s92_s30, [#allocation9], %s2784_s2, %s2784_s2, %s2785_s23  }
  0x40   :  { %s2791_s1 = smov [#allocation11]  }
  0x41   :  { %s111_s20 = sshll.u32 %s2791_s1, 4  ;;  %s112_s20 = int_to_ptr.vmem [resolvable:$true] %s111_s20 }
  0x42   :  { %s2740_s21 = scalar_lea.vmem %s112_s20, 256  ;;  %p2745_p12 = scmp.lt.s32.totalorder %s112_s20, %s112_s20 }
  0x43   :  { %p2741_p11 = scmp.ne.s32.totalorder %s112_s20, %s2740_s21  ;;  %p2746_p13 = scmp.lt.s32.totalorder %s2740_s21, %s2740_s21 }
  0x45   :  { %p2747_p0 = por %p2746_p13, %p2745_p12 }
  0x47   :  { %p2748_p1 = pnand %p2747_p0, %p2741_p11 }
  0x49   :  { %2751 = shalt.err (!%p2748_p1)
}
  0x4a   :  { %s2792_s3 = smov 64   ;;  %s2793_s22 = smov 4  }
  0x4b   :  { %117 = dma.hbm_to_vmem [thread:$0]  %s3339_s16, 256, %s112_s20, [#allocation12], %s2792_s3, %s2792_s3, %s2793_s22  }
  0x4c   :  { %2772 = dma.done.wait [#allocation3], 256  }
  0x4d   :  { %2773 = vsyncadd [#allocation3], 4294967040 }
  0x4e   :  { %2774 = dma.done.wait [#allocation6], 32  }
  0x4f   :  { %2775 = vsyncadd [#allocation6], 4294967264 }
  0x50   :  { %2776 = dma.done.wait [#allocation9], 64  }
  0x51   :  { %2777 = vsyncadd [#allocation9], 4294967232 }
  0x52   :  { %2778 = dma.done.wait [#allocation12], 256  }
  0x53   :  { %2779 = vsyncadd [#allocation12], 4294967040  ;;  %v2794_v0 = vmov 0.0   ;;  %vm2795_vm0 = vmmov 0   ;;  %v2530_v1 = vld [vmem:[%s3327_s4 + $0x8] sm:$0xff]   ;;  %v2531_v2 = vld [vmem:[%s3327_s4] sm:$0xff]  }
  0x54   :  { %2264 = vmatprep.subr.bf16.mxu0 %v2794_v0  ;;  %2268 = vmatprep.mubr.msk.bf16.mxu0 %vm2795_vm0, %v2794_v0  ;;  %v2938_v3 = vld [vmem:[#allocation2] sm:$0xff]  ;;  %v2940_v4 = vld [vmem:[#allocation2 + $0x8] sm:$0xff]  ;;  %vm245_vm1 = vcmask 261120   ;;  %s2796_s28 = smov 104   ;;  %s2797_s19 = smov 120   ;;  %v2798_v14 = vmov 0  }
  0x55   :  { %2272 = vmatprep.subr.bf16.mxu1 %v2794_v0  ;;  %2274 = vmatprep.mubr.msk.bf16.mxu1 %vm2795_vm0, %v2794_v0  ;;  %v226_v5 = vpack.c.bf16 %v2940_v4, %v2938_v3  ;;  %v2134_v7 = vld [vmem:[%s3328_s5] ss:$0 sm:$0xff]  ;;  %s2799_s27 = smov 112   ;;  %s2800_s29 = smov 96   ;;  %vm317_vm2 = vcmask 64512   ;;  %vm515_vm5 = vcmask 130048  }
  0x56   :  { %2265 = vmatpush3.bf16.msra.mxu0 %v2530_v1  ;;  %2483 = vset.pattern.permute.xlu1 %v2798_v14  ;;  %s3348_s21 = sld [smem:[#allocation20_spill]]  ;;  %v2133_v38 = vld [vmem:[#allocation5] ss:$0 sm:$0xff]  ;;  %v2801_v41 = vmov -1e+30   ;;  %s2802_s30 = smov 24  }
  0x57   :  { %2266 = vmatprep.subr.bf16.mxu0 %v2794_v0  ;;  %2484 = vset.pattern.permute.xlu0 %v2798_v14  ;;  %vm824_vm6 = vcmask 195584   ;;  %vm1031_vm7 = vcmask 523264  }
  0x5a   :  { %2267 = vmatpush3.bf16.msra.mxu0 %v2531_v2 }
  0x5b   :  { %2278 = vmatprep.subr.bf16.mxu0 %v2794_v0 }
  0x5c   :  { %v141_v30 = vld [vmem:[%s3348_s21] sm:$0xff]  ;;  %v142_v31 = vld [vmem:[%s3348_s21 + $0x8] sm:$0xff]  ;;  %s2803_s21 = smov [#allocation13]  }
  0x5d   :  { %2269 = vmatmul.mubr.msk.bf16.vlgmr.msra.gmra.mxu0 %vm245_vm1, %v226_v5 }
  0x5e   :  { %2280 = vmatprep.mubr.msk.bf16.mxu0 %vm2795_vm0, %v2794_v0 }
 0x11d   :  { %v283_v6 = vpop.f32.mrf.mxu0 }
 0x11e   :  { %v284_v10 = vadd.f32 %v2134_v7, %v283_v6 }
 0x11f   :  { %v2270_v8 = vpop.f32.mrf.mxu0 }
 0x121   :  { %v286_v9 = vpop.f32.mrf.mxu0 }
 0x122   :  { %v287_v11 = vadd.f32 %v2134_v7, %v286_v9 }
 0x123   :  { %v2271_v12 = vpop.f32.mrf.mxu0 }
 0x124   :  { %v2478_v13 = vpack.i.bf16 %v287_v11, %v284_v10  ;;  %v2954_v15 = vpack.c.bf16 %v287_v11, %v284_v10 }
 0x126   :  { %2479 = vrot.lane.b32.xlu1 %v2478_v13, %s2796_s28  ;;  %2469 = vrot.lane.b32.xlu0 %v2478_v13, %s2797_s19 }
 0x12a   :  { %2474 = vrot.lane.b32.xlu0 %v2478_v13, %s2799_s27  ;;  %315 = vrot.lane.b32.xlu1 %v2954_v15, %s2800_s29 }
 0x198   :  { %v2480_v16 = vpop.permute.xlu1 %2479  ;;  %v2470_v17 = vpop.permute.xlu0 %2469 }
 0x199   :  { %v2472_v18 = vunpack.i.h.bf16 %v2470_v17  ;;  %v2471_v19 = vunpack.i.l.bf16 %v2470_v17  ;;  %v2482_v20 = vunpack.i.h.bf16 %v2480_v16  ;;  %v2481_v21 = vunpack.i.l.bf16 %v2480_v16 }
 0x19b   :  { %v2959_v22 = vpack.c.bf16 %v2472_v18, %v2471_v19  ;;  %v2964_v28 = vpack.c.bf16 %v2482_v20, %v2481_v21 }
 0x19c   :  { %v2475_v23 = vpop.permute.xlu0 %2474  ;;  %v316_v24 = vpop.permute.xlu1 %315 }
 0x19d   :  { %v2477_v25 = vunpack.i.h.bf16 %v2475_v23  ;;  %v2476_v26 = vunpack.i.l.bf16 %v2475_v23  ;;  %366 = vrot.lane.b32.xlu0 %v2959_v22, %s2800_s29  ;;  %v322_v27 = vsel %vm317_vm2, %v316_v24, 0 }
 0x19e   :  { %2273 = vmatpush3.bf16.xpose.msra.mxu1 %v322_v27 }
 0x19f   :  { %v2966_v29 = vpack.c.bf16 %v2477_v25, %v2476_v26  ;;  %2284 = vmatprep.subr.bf16.mxu1 %v2794_v0 }
 0x1a1   :  { %466 = vrot.lane.b32.xlu0 %v2964_v28, %s2800_s29  ;;  %416 = vrot.lane.b32.xlu1 %v2966_v29, %s2800_s29 }
 0x1a5   :  { %2275 = vmatmul.mubr.msk.bf16.vlgmr.msra.gmra.mxu1 %vm317_vm2, %v2954_v15  ;;  %208 = vperm.xlu1 %2483, %v141_v30  }
 0x1a6   :  { %213 = vperm.xlu0 %2484, %v142_v31   ;;  %2286 = vmatprep.mubr.msk.bf16.mxu1 %vm2795_vm0, %v2794_v0 }
 0x20f   :  { %v367_v32 = vpop.permute.xlu0 %366 }
 0x210   :  { %v372_v33 = vsel %vm317_vm2, %v367_v32, 0 }
 0x211   :  { %2279 = vmatpush3.bf16.xpose.msra.mxu0 %v372_v33 }
 0x212   :  { %2290 = vmatprep.subr.bf16.mxu0 %v2794_v0 }
 0x213   :  { %v417_v34 = vpop.permute.xlu1 %416  ;;  %v467_v36 = vpop.permute.xlu0 %466 }
 0x214   :  { %v422_v35 = vsel %vm317_vm2, %v417_v34, 0  ;;  %v472_v37 = vsel %vm317_vm2, %v467_v36, 0 }
 0x215   :  { %2285 = vmatpush3.bf16.xpose.msra.mxu1 %v422_v35 }
 0x216   :  { %2296 = vmatprep.subr.bf16.mxu1 %v2794_v0 }
 0x218   :  { %2281 = vmatmul.mubr.msk.bf16.vlgmr.msra.gmra.mxu0 %vm317_vm2, %v2959_v22 }
 0x219   :  { %2291 = vmatpush3.bf16.xpose.msra.mxu0 %v472_v37  ;;  %2292 = vmatprep.mubr.msk.bf16.mxu0 %vm2795_vm0, %v2794_v0 }
 0x21a   :  { %2302 = vmatprep.subr.bf16.mxu0 %v2794_v0 }
 0x21c   :  { %2287 = vmatmul.mubr.msk.bf16.vlgmr.msra.gmra.mxu1 %vm317_vm2, %v2966_v29 }
 0x21d   :  { %2298 = vmatprep.mubr.msk.bf16.mxu1 %vm2795_vm0, %v2794_v0 }
 0x220   :  { %2293 = vmatmul.mubr.msk.bf16.vlgmr.msra.gmra.mxu0 %vm317_vm2, %v2964_v28  ;;  %v209_v39 = vpop.permute.xlu1 %208 }
 0x221   :  { %2304 = vmatprep.mubr.msk.bf16.mxu0 %vm2795_vm0, %v2794_v0  ;;  %vm222_vm3 = vcmp.eq.f32.partialorder %v209_v39, %v2133_v38  ;;  %v214_v40 = vpop.permute.xlu0 %213 }
 0x222   :  { %v3001_v42 = vsel %vm222_vm3, 0.0, %v2801_v41  ;;  %vm223_vm4 = vcmp.eq.f32.partialorder %v214_v40, %v2133_v38 }
 0x223   :  { %v3004_v45 = vsel %vm223_vm4, 0.0, %v2801_v41 }
 0x265   :  { %v358_v43 = vpop.f32.mrf.mxu1 }
 0x266   :  { %v359_v44 = vadd.f32 %v358_v43, %v3001_v42 }
 0x267   :  { %v2276_v46 = vpop.f32.mrf.mxu1 }
 0x268   :  { %v516_v47 = vsel %vm515_vm5, %v359_v44, -inf }
 0x269   :  { %v361_v48 = vpop.f32.mrf.mxu1  ;;  %517 = vmax.xlane.f32.xlu1 %v516_v47 }
 0x26a   :  { %v362_v49 = vadd.f32 %v361_v48, %v3004_v45 }
 0x26b   :  { %v2277_v50 = vpop.f32.mrf.mxu1 }
 0x26c   :  { %v519_v51 = vsel %vm515_vm5, %v362_v49, -inf }
 0x26d   :  { %520 = vmax.xlane.f32.xlu0 %v519_v51 }
 0x2d8   :  { %v408_v52 = vpop.f32.mrf.mxu0 }
 0x2d9   :  { %v409_v53 = vadd.f32 %v408_v52, %v3001_v42 }
 0x2da   :  { %v2282_v54 = vpop.f32.mrf.mxu0 }
 0x2db   :  { %v522_v55 = vsel %vm515_vm5, %v409_v53, -inf }
 0x2dc   :  { %v458_v56 = vpop.f32.mrf.mxu1  ;;  %523 = vmax.xlane.f32.xlu1 %v522_v55  ;;  %v411_v57 = vpop.f32.mrf.mxu0 }
 0x2dd   :  { %v459_v58 = vadd.f32 %v458_v56, %v3001_v42  ;;  %v412_v59 = vadd.f32 %v411_v57, %v3004_v45 }
 0x2de   :  { %v2283_v60 = vpop.f32.mrf.mxu0  ;;  %v2288_v61 = vpop.f32.mrf.mxu1 }
 0x2df   :  { %v528_v62 = vsel %vm515_vm5, %v459_v58, -inf  ;;  %v525_v63 = vsel %vm515_vm5, %v412_v59, -inf }
 0x2e0   :  { %v461_v1 = vpop.f32.mrf.mxu1  ;;  %529 = vmax.xlane.f32.xlu1 %v528_v62  ;;  %526 = vmax.xlane.f32.xlu0 %v525_v63  ;;  %v508_v2 = vpop.f32.mrf.mxu0 }
 0x2e1   :  { %v462_v5 = vadd.f32 %v461_v1, %v3004_v45  ;;  %v509_v6 = vadd.f32 %v508_v2, %v3001_v42 }
 0x2e2   :  { %v2289_v7 = vpop.f32.mrf.mxu1  ;;  %v2294_v8 = vpop.f32.mrf.mxu0 }
 0x2e3   :  { %v531_v9 = vsel %vm515_vm5, %v462_v5, -inf  ;;  %v534_v10 = vsel %vm515_vm5, %v509_v6, -inf }
 0x2e4   :  { %532 = vmax.xlane.f32.xlu0 %v531_v9  ;;  %535 = vmax.xlane.f32.xlu1 %v534_v10  ;;  %v511_v11 = vpop.f32.mrf.mxu0 }
 0x2e5   :  { %v512_v12 = vadd.f32 %v511_v11, %v3004_v45 }
 0x2e6   :  { %v2295_v13 = vpop.f32.mrf.mxu0 }
 0x2e7   :  { %v537_v14 = vsel %vm515_vm5, %v512_v12, -inf }
 0x2e8   :  { %538 = vmax.xlane.f32.xlu0 %v537_v14 }
 0x2f2   :  { %v518_v19 = vpop.xlane.xlu1 %517 }
 0x2f3   :  { %v540_v20 = vsub.f32 %v359_v44, %v518_v19 }
 0x2f5   :  { %608 = vrot.lane.b32.xlu1 %v2954_v15, %s2792_s3  ;;  %v548_v21 = vmul.f32 1.442695, %v540_v20 }
 0x2f6   :  { %v521_v16 = vpop.xlane.xlu0 %520 }
 0x2f7   :  { %v541_v17 = vsub.f32 %v362_v49, %v521_v16 }
 0x2f9   :  { %v550_v18 = vmul.f32 1.442695, %v541_v17 }
 0x2fb   :  { %2552 = vpow2.f32 %v550_v18 }
 0x2fc   :  { %2554 = vpow2.f32 %v548_v21 }
 0x308   :  { %v2553_v23 = vpop.eup %2552 }
 0x309   :  { %v567_v24 = vsel %vm515_vm5, %v2553_v23, 0.0  ;;  %v2555_v25 = vpop.eup %2554 }
 0x30a   :  { %568 = vadd.xlane.f32.xlu0 %v567_v24  ;;  %v564_v26 = vsel %vm515_vm5, %v2555_v25, 0.0 }
 0x319   :  { %565 = vadd.xlane.f32.xlu1 %v564_v26 }
 0x365   :  { %v524_v27 = vpop.xlane.xlu1 %523 }
 0x366   :  { %v542_v30 = vsub.f32 %v409_v53, %v524_v27 }
 0x368   :  { %v552_v31 = vmul.f32 1.442695, %v542_v30 }
 0x369   :  { %v530_v15 = vpop.xlane.xlu1 %529  ;;  %v527_v32 = vpop.xlane.xlu0 %526 }
 0x36a   :  { %2556 = vpow2.f32 %v552_v31  ;;  %v544_v33 = vsub.f32 %v459_v58, %v530_v15  ;;  %v543_v34 = vsub.f32 %v412_v59, %v527_v32 }
 0x36c   :  { %v556_v35 = vmul.f32 1.442695, %v544_v33  ;;  %v554_v36 = vmul.f32 1.442695, %v543_v34 }
 0x36d   :  { %v533_v37 = vpop.xlane.xlu0 %532  ;;  %v536_v38 = vpop.xlane.xlu1 %535 }
 0x36e   :  { %2558 = vpow2.f32 %v556_v35  ;;  %v545_v39 = vsub.f32 %v462_v5, %v533_v37  ;;  %v546_v40 = vsub.f32 %v509_v6, %v536_v38  ;;  %v2532_v35 = vld [vmem:[%s3329_s6 + $0x8] sm:$0xff]   ;;  %v2533_v38 = vld [vmem:[%s3329_s6] sm:$0xff]  }
 0x36f   :  { %2560 = vpow2.f32 %v554_v36 }
 0x370   :  { %v558_v41 = vmul.f32 1.442695, %v545_v39  ;;  %v560_v43 = vmul.f32 1.442695, %v546_v40 }
 0x371   :  { %v609_v44 = vpop.permute.xlu1 %608  ;;  %v539_v46 = vpop.xlane.xlu0 %538 }
 0x372   :  { %2562 = vpow2.f32 %v558_v41  ;;  %v547_v47 = vsub.f32 %v512_v12, %v539_v46  ;;  %2297 = vmatpush3.bf16.msra.mxu1 %v609_v44 }
 0x373   :  { %2564 = vpow2.f32 %v560_v43  ;;  %2308 = vmatprep.subr.bf16.mxu1 %v2794_v0 }
 0x374   :  { %v562_v48 = vmul.f32 1.442695, %v547_v47 }
 0x376   :  { %2566 = vpow2.f32 %v562_v48 }
 0x377   :  { %v2557_v49 = vpop.eup %2556 }
 0x378   :  { %v570_v50 = vsel %vm515_vm5, %v2557_v49, 0.0 }
 0x379   :  { %571 = vadd.xlane.f32.xlu1 %v570_v50 }
 0x37b   :  { %v2559_v51 = vpop.eup %2558 }
 0x37c   :  { %v2561_v52 = vpop.eup %2560  ;;  %v576_v53 = vsel %vm515_vm5, %v2559_v51, 0.0 }
 0x37d   :  { %577 = vadd.xlane.f32.xlu1 %v576_v53  ;;  %v573_v54 = vsel %vm515_vm5, %v2561_v52, 0.0 }
 0x37e   :  { %574 = vadd.xlane.f32.xlu0 %v573_v54 }
 0x37f   :  { %v2563_v55 = vpop.eup %2562 }
 0x380   :  { %v2565_v56 = vpop.eup %2564  ;;  %v579_v57 = vsel %vm515_vm5, %v2563_v55, 0.0 }
 0x381   :  { %v582_v58 = vsel %vm515_vm5, %v2565_v56, 0.0 }
 0x382   :  { %583 = vadd.xlane.f32.xlu1 %v582_v58  ;;  %580 = vadd.xlane.f32.xlu0 %v579_v57 }
 0x383   :  { %v2567_v59 = vpop.eup %2566 }
 0x384   :  { %v585_v60 = vsel %vm515_vm5, %v2567_v59, 0.0 }
 0x386   :  { %586 = vadd.xlane.f32.xlu0 %v585_v60 }
 0x393   :  { %702 = vrot.lane.b32.xlu1 %v2966_v29, %s2792_s3  ;;  %v569_v61 = vpop.xlane.xlu0 %568 }
 0x394   :  { %2568 = vrcp.f32 %v569_v61 }
 0x397   :  { %749 = vrot.lane.b32.xlu1 %v2964_v28, %s2792_s3 }
 0x39c   :  { %655 = vrot.lane.b32.xlu0 %v2959_v22, %s2792_s3 }
 0x3a1   :  { %v2569_v63 = vpop.eup %2568 }
 0x3a2   :  { %v566_v62 = vpop.xlane.xlu1 %565  ;;  %v591_v5 = vmul.f32 %v2569_v63, %v2553_v23 }
 0x3a3   :  { %2570 = vrcp.f32 %v566_v62 }
 0x3b0   :  { %v2571_v1 = vpop.eup %2570 }
 0x3b1   :  { %v589_v2 = vmul.f32 %v2571_v1, %v2555_v25 }
 0x3b3   :  { %v604_v6 = vpack.c.bf16 %v591_v5, %v589_v2 }
 0x3b5   :  { %2299 = vmatmul.mubr.msk.bf16.vlgmr.msra.gmra.mxu1 %vm515_vm5, %v604_v6 }
 0x3b6   :  { %2310 = vmatprep.mubr.msk.bf16.mxu1 %vm2795_vm0, %v2794_v0 }
 0x402   :  { %v572_v29 = vpop.xlane.xlu1 %571 }
 0x403   :  { %2572 = vrcp.f32 %v572_v29 }
 0x406   :  { %v578_v28 = vpop.xlane.xlu1 %577 }
 0x407   :  { %v575_v7 = vpop.xlane.xlu0 %574 }
 0x408   :  { %2574 = vrcp.f32 %v575_v7  ;;  %v2146_v7 = vld [vmem:[%s3330_s7] ss:$0 sm:$0xff] }
 0x409   :  { %2576 = vrcp.f32 %v578_v28 }
 0x40b   :  { %v584_v22 = vpop.xlane.xlu1 %583  ;;  %v581_v8 = vpop.xlane.xlu0 %580 }
 0x40c   :  { %2578 = vrcp.f32 %v581_v8 }
 0x40d   :  { %2580 = vrcp.f32 %v584_v22 }
 0x40f   :  { %v703_v9 = vpop.permute.xlu1 %702  ;;  %v587_v10 = vpop.xlane.xlu0 %586 }
 0x410   :  { %2582 = vrcp.f32 %v587_v10  ;;  %2309 = vmatpush3.bf16.msra.mxu1 %v703_v9  ;;  %v2573_v11 = vpop.eup %2572 }
 0x411   :  { %2320 = vmatprep.subr.bf16.mxu1 %v2794_v0  ;;  %v593_v14 = vmul.f32 %v2573_v11, %v2557_v49 }
 0x413   :  { %v656_v12 = vpop.permute.xlu0 %655  ;;  %v750_v20 = vpop.permute.xlu1 %749 }
 0x414   :  { %2303 = vmatpush3.bf16.msra.mxu0 %v656_v12 }
 0x415   :  { %v2575_v13 = vpop.eup %2574  ;;  %2314 = vmatprep.subr.bf16.mxu0 %v2794_v0 }
 0x416   :  { %v595_v16 = vmul.f32 %v2575_v13, %v2561_v52  ;;  %v2577_v17 = vpop.eup %2576 }
 0x417   :  { %v597_v23 = vmul.f32 %v2577_v17, %v2559_v51 }
 0x418   :  { %v605_v18 = vpack.c.bf16 %v595_v16, %v593_v14 }
 0x419   :  { %v2579_v19 = vpop.eup %2578 }
 0x41a   :  { %2305 = vmatmul.mubr.msk.bf16.vlgmr.msra.gmra.mxu0 %vm515_vm5, %v605_v18  ;;  %v2581_v21 = vpop.eup %2580  ;;  %v599_v24 = vmul.f32 %v2579_v19, %v2563_v55 }
 0x41b   :  { %2315 = vmatpush3.bf16.msra.mxu0 %v750_v20  ;;  %2316 = vmatprep.mubr.msk.bf16.mxu0 %vm2795_vm0, %v2794_v0  ;;  %v601_v27 = vmul.f32 %v2581_v21, %v2565_v56 }
 0x41c   :  { %2328 = vmatprep.subr.bf16.mxu0 %v2794_v0  ;;  %v606_v26 = vpack.c.bf16 %v599_v24, %v597_v23 }
 0x41d   :  { %v2583_v25 = vpop.eup %2582 }
 0x41e   :  { %v603_v30 = vmul.f32 %v2583_v25, %v2567_v59  ;;  %2311 = vmatmul.mubr.msk.bf16.vlgmr.msra.gmra.mxu1 %vm515_vm5, %v606_v26 }
 0x41f   :  { %2324 = vmatprep.mubr.msk.bf16.mxu1 %vm2795_vm0, %v2794_v0  ;;  %2321 = vmatpush3.bf16.msra.mxu1 %v2532_v35 }
 0x420   :  { %v607_v31 = vpack.c.bf16 %v603_v30, %v601_v27  ;;  %2322 = vmatprep.subr.bf16.mxu1 %v2794_v0  ;;  %v2535_v30 = vld [vmem:[%s3333_s10] sm:$0xff]  }
 0x422   :  { %2317 = vmatmul.mubr.msk.bf16.vlgmr.msra.gmra.mxu0 %vm515_vm5, %v607_v31  ;;  %v2536_v31 = vld [vmem:[%s3335_s12 + $0x18] sm:$0xff]  }
 0x423   :  { %2332 = vmatprep.mubr.msk.bf16.mxu0 %vm2795_vm0, %v2794_v0  ;;  %2323 = vmatpush3.bf16.msra.mxu1 %v2533_v38 }
 0x424   :  { %2336 = vmatprep.subr.bf16.mxu1 %v2794_v0 }
 0x475   :  { %v648_v15 = vpop.f32.mrf.mxu1 }
 0x477   :  { %v2300_v32 = vpop.f32.mrf.mxu1 }
 0x479   :  { %v651_v33 = vpop.f32.mrf.mxu1 }
 0x47b   :  { %v2301_v34 = vpop.f32.mrf.mxu1 }
 0x4da   :  { %v695_v36 = vpop.f32.mrf.mxu0 }
 0x4dc   :  { %v2306_v37 = vpop.f32.mrf.mxu0 }
 0x4de   :  { %v698_v39 = vpop.f32.mrf.mxu0  ;;  %v742_v41 = vpop.f32.mrf.mxu1 }
 0x4df   :  { %v2485_v40 = vpack.i.bf16 %v698_v39, %v695_v36  ;;  %v2150_v39 = vld [vmem:[%s3331_s8] ss:$0 sm:$0xff] }
 0x4e0   :  { %v2307_v43 = vpop.f32.mrf.mxu0  ;;  %v2312_v44 = vpop.f32.mrf.mxu1 }
 0x4e1   :  { %2486 = vrot.lane.b32.xlu0 %v2485_v40, %s2788_s0  ;;  %v2151_v44 = vld [vmem:[#allocation8] ss:$0 sm:$0xff] }
 0x4e2   :  { %v789_v46 = vpop.f32.mrf.mxu0  ;;  %v745_v47 = vpop.f32.mrf.mxu1 }
 0x4e3   :  { %v2490_v48 = vpack.i.bf16 %v745_v47, %v742_v41 }
 0x4e4   :  { %v2318_v49 = vpop.f32.mrf.mxu0  ;;  %v2313_v50 = vpop.f32.mrf.mxu1 }
 0x4e5   :  { %2491 = vrot.lane.b32.xlu1 %v2490_v48, %s2784_s2  ;;  %v2537_v50 = vld [vmem:[%s3335_s12 + $0x10] sm:$0xff]  }
 0x4e6   :  { %v792_v51 = vpop.f32.mrf.mxu0 }
 0x4e7   :  { %v2495_v52 = vpack.i.bf16 %v792_v51, %v789_v46  ;;  %v2538_v51 = vld [vmem:[%s3335_s12 + $0x8] sm:$0xff]  }
 0x4e8   :  { %v2319_v53 = vpop.f32.mrf.mxu0 }
 0x4e9   :  { %2496 = vrot.lane.b32.xlu0 %v2495_v52, %s2802_s30  ;;  %v2539_v52 = vld [vmem:[%s3335_s12] sm:$0xff]   ;;  %v2152_v53 = vld [vmem:[#allocation10] ss:$0 sm:$0xff] }
 0x553   :  { %v2487_v54 = vpop.permute.xlu0 %2486 }
 0x554   :  { %v2489_v55 = vunpack.i.h.bf16 %v2487_v54  ;;  %v2488_v56 = vunpack.i.l.bf16 %v2487_v54 }
 0x556   :  { %v821_v61 = vsel %vm317_vm2, %v651_v33, %v2489_v55  ;;  %v820_v62 = vsel %vm317_vm2, %v648_v15, %v2488_v56 }
 0x557   :  { %v2492_v57 = vpop.permute.xlu1 %2491 }
 0x558   :  { %v2494_v58 = vunpack.i.h.bf16 %v2492_v57  ;;  %v2493_v59 = vunpack.i.l.bf16 %v2492_v57 }
 0x55a   :  { %v822_v2 = vsel %vm515_vm5, %v820_v62, %v2493_v59  ;;  %v823_v5 = vsel %vm515_vm5, %v821_v61, %v2494_v58 }
 0x55b   :  { %v2497_v60 = vpop.permute.xlu0 %2496 }
 0x55c   :  { %v2499_v63 = vunpack.i.h.bf16 %v2497_v60  ;;  %v2498_v1 = vunpack.i.l.bf16 %v2497_v60 }
 0x55e   :  { %v826_v6 = vsel %vm824_vm6, %v823_v5, %v2499_v63  ;;  %v825_v29 = vsel %vm824_vm6, %v822_v2, %v2498_v1  ;;  %v2156_v63 = vld [vmem:[%s3336_s13] ss:$0 sm:$0xff] }
 0x55f   :  { %v827_v28 = vpack.c.bf16 %v826_v6, %v825_v29 }
 0x561   :  { %2325 = vmatmul.mubr.msk.bf16.vlgmr.msra.gmra.mxu1 %vm245_vm1, %v827_v28 }
 0x562   :  { %2344 = vmatprep.mubr.msk.bf16.mxu1 %vm2795_vm0, %v2794_v0  ;;  %2337 = vmatpush3.bf16.msra.mxu1 %v2536_v31 }
 0x563   :  { %2338 = vmatprep.subr.bf16.mxu1 %v2794_v0 }
 0x566   :  { %2339 = vmatpush3.bf16.msra.mxu1 %v2537_v50 }
 0x567   :  { %2340 = vmatprep.subr.bf16.mxu1 %v2794_v0 }
 0x56a   :  { %2341 = vmatpush3.bf16.msra.mxu1 %v2538_v51 }
 0x56b   :  { %2342 = vmatprep.subr.bf16.mxu1 %v2794_v0 }
 0x56e   :  { %2343 = vmatpush3.bf16.msra.mxu1 %v2539_v52 }
 0x56f   :  { %2362 = vmatprep.subr.bf16.mxu1 %v2794_v0 }
 0x621   :  { %v883_v22 = vpop.f32.mrf.mxu1 }
 0x622   :  { %v884_v8 = vadd.f32 %v2146_v7, %v883_v22 }
 0x623   :  { %v2326_v9 = vpop.f32.mrf.mxu1 }
 0x624   :  { %v890_v10 = vadd.f32 %v884_v8, %v2938_v3 }
 0x625   :  { %v886_v11 = vpop.f32.mrf.mxu1 }
 0x626   :  { %v887_v12 = vadd.f32 %v2146_v7, %v886_v11  ;;  %v892_v13 = vsel %vm245_vm1, %v890_v10, 0.0 }
 0x627   :  { %893 = vadd.xlane.f32.xlu1 %v892_v13  ;;  %v2327_v14 = vpop.f32.mrf.mxu1 }
 0x628   :  { %v891_v16 = vadd.f32 %v887_v12, %v2940_v4  ;;  %v2534_v4 = vld [vmem:[%s3333_s10 + $0x8] sm:$0xff]  }
 0x629   :  { %2329 = vmatpush3.bf16.msra.mxu0 %v2534_v4 }
 0x62a   :  { %v895_v17 = vsel %vm245_vm1, %v891_v16, 0.0  ;;  %2330 = vmatprep.subr.bf16.mxu0 %v2794_v0 }
 0x62b   :  { %896 = vadd.xlane.f32.xlu0 %v895_v17 }
 0x62d   :  { %2331 = vmatpush3.bf16.msra.mxu0 %v2535_v30 }
 0x62e   :  { %2348 = vmatprep.subr.bf16.mxu0 %v2794_v0 }
 0x6b0   :  { %v894_v18 = vpop.xlane.xlu1 %893 }
 0x6b1   :  { %v899_v19 = vmul.f32 0.03125, %v894_v18 }
 0x6b3   :  { %v901_v20 = vsub.f32 %v890_v10, %v899_v19 }
 0x6b4   :  { %v897_v21 = vpop.xlane.xlu0 %896 }
 0x6b5   :  { %v900_v23 = vmul.f32 0.03125, %v897_v21  ;;  %v903_v24 = vmul.f32 %v901_v20, %v901_v20  ;;  %v2540_v21 = vld [vmem:[%s3327_s4 + $0x18] sm:$0xff]  }
 0x6b7   :  { %v902_v25 = vsub.f32 %v891_v16, %v900_v23  ;;  %v905_v3 = vsel %vm245_vm1, %v903_v24, 0.0  ;;  %v2541_v23 = vld [vmem:[%s3327_s4 + $0x10] sm:$0xff]  }
 0x6b8   :  { %906 = vadd.xlane.f32.xlu0 %v905_v3 }
 0x6b9   :  { %v904_v26 = vmul.f32 %v902_v25, %v902_v25 }
 0x6bb   :  { %v908_v27 = vsel %vm245_vm1, %v904_v26, 0.0 }
 0x6bc   :  { %909 = vadd.xlane.f32.xlu1 %v908_v27 }
 0x741   :  { %v907_v15 = vpop.xlane.xlu0 %906 }
 0x742   :  { %v911_v32 = vmul.f32 0.03125, %v907_v15  ;;  %v2162_v15 = vld [vmem:[%s3337_s14] ss:$0 sm:$0xff] }
 0x744   :  { %v913_v33 = vadd.f32 1e-05, %v911_v32 }
 0x745   :  { %v910_v34 = vpop.xlane.xlu1 %909 }
 0x746   :  { %2584 = vrsqrt.f32 %v913_v33  ;;  %v912_v35 = vmul.f32 0.03125, %v910_v34 }
 0x748   :  { %v914_v36 = vadd.f32 1e-05, %v912_v35  ;;  %v2163_v35 = vld [vmem:[%s3338_s15] ss:$0 sm:$0xff] }
 0x74a   :  { %2586 = vrsqrt.f32 %v914_v36 }
 0x753   :  { %v2585_v37 = vpop.eup %2584 }
 0x754   :  { %v917_v38 = vmul.f32 %v2585_v37, %v901_v20 }
 0x756   :  { %v925_v43 = vmul.f32 %v2150_v39, %v917_v38 }
 0x757   :  { %v2587_v40 = vpop.eup %2586 }
 0x758   :  { %v918_v41 = vmul.f32 %v2587_v40, %v902_v25  ;;  %v933_v47 = vadd.f32 %v2151_v44, %v925_v43 }
 0x75a   :  { %v926_v46 = vmul.f32 %v2150_v39, %v918_v41  ;;  %v2164_v41 = vld [vmem:[%s3328_s5 + $0x1] ss:$0 sm:$0xff]  ;;  %s2121_s5 = sshll.u32 %s2803_s21, 4  ;;  %s2122_s5 = int_to_ptr.vmem [resolvable:$true] %s2121_s5 }
 0x75b   :  { %p2757_p3 = scmp.lt.s32.totalorder %s2122_s5, %s2122_s5 }
 0x75c   :  { %v934_v48 = vadd.f32 %v2151_v44, %v926_v46 }
 0x75e   :  { %v935_v49 = vpack.c.bf16 %v934_v48, %v933_v47 }
 0x760   :  { %2333 = vmatmul.mubr.msk.bf16.vlgmr.msra.gmra.mxu0 %vm245_vm1, %v935_v49 }
 0x761   :  { %2352 = vmatprep.mubr.msk.bf16.mxu0 %vm2795_vm0, %v2794_v0  ;;  %2349 = vmatpush3.bf16.msra.mxu0 %v2540_v21 }
 0x762   :  { %2350 = vmatprep.subr.bf16.mxu0 %v2794_v0 }
 0x765   :  { %2351 = vmatpush3.bf16.msra.mxu0 %v2541_v23 }
 0x766   :  { %2356 = vmatprep.subr.bf16.mxu0 %v2794_v0 }
 0x820   :  { %v991_v54 = vpop.f32.mrf.mxu0 }
 0x821   :  { %v992_v56 = vadd.f32 %v2152_v53, %v991_v54 }
 0x822   :  { %v2334_v55 = vpop.f32.mrf.mxu0 }
 0x823   :  { %v998_v60 = vmax.f32 %v992_v56, 0.0 }
 0x824   :  { %v994_v57 = vpop.f32.mrf.mxu0 }
 0x825   :  { %v995_v58 = vadd.f32 %v2152_v53, %v994_v57 }
 0x826   :  { %v2335_v59 = vpop.f32.mrf.mxu0 }
 0x827   :  { %v999_v61 = vmax.f32 %v995_v58, 0.0 }
 0x829   :  { %v1000_v62 = vpack.c.bf16 %v999_v61, %v998_v60 }
 0x82b   :  { %2345 = vmatmul.mubr.msk.bf16.vlgmr.msra.gmra.mxu1 %vm1031_vm7, %v1000_v62 }
 0x82c   :  { %2364 = vmatprep.mubr.msk.bf16.mxu1 %vm2795_vm0, %v2794_v0 }
 0x8eb   :  { %v1069_v1 = vpop.f32.mrf.mxu1 }
 0x8ec   :  { %v1070_v2 = vadd.f32 %v2156_v63, %v1069_v1 }
 0x8ed   :  { %v2346_v5 = vpop.f32.mrf.mxu1 }
 0x8ee   :  { %v1076_v6 = vadd.f32 %v1070_v2, %v933_v47 }
 0x8ef   :  { %v1072_v29 = vpop.f32.mrf.mxu1 }
 0x8f0   :  { %v1073_v28 = vadd.f32 %v2156_v63, %v1072_v29  ;;  %v1078_v7 = vsel %vm245_vm1, %v1076_v6, 0.0 }
 0x8f1   :  { %1079 = vadd.xlane.f32.xlu0 %v1078_v7  ;;  %v2347_v22 = vpop.f32.mrf.mxu1 }
 0x8f2   :  { %v1077_v8 = vadd.f32 %v1073_v28, %v934_v48 }
 0x8f4   :  { %v1081_v9 = vsel %vm245_vm1, %v1077_v8, 0.0 }
 0x8f5   :  { %1082 = vadd.xlane.f32.xlu1 %v1081_v9 }
 0x97a   :  { %v1080_v10 = vpop.xlane.xlu0 %1079 }
 0x97b   :  { %v1084_v11 = vmul.f32 0.03125, %v1080_v10 }
 0x97d   :  { %v1086_v12 = vsub.f32 %v1076_v6, %v1084_v11 }
 0x97e   :  { %v1083_v13 = vpop.xlane.xlu1 %1082 }
 0x97f   :  { %v1085_v14 = vmul.f32 0.03125, %v1083_v13  ;;  %v1088_v16 = vmul.f32 %v1086_v12, %v1086_v12 }
 0x981   :  { %v1087_v17 = vsub.f32 %v1077_v8, %v1085_v14  ;;  %v1090_v18 = vsel %vm245_vm1, %v1088_v16, 0.0 }
 0x982   :  { %1091 = vadd.xlane.f32.xlu0 %v1090_v18 }
 0x983   :  { %v1089_v19 = vmul.f32 %v1087_v17, %v1087_v17 }
 0x985   :  { %v1093_v20 = vsel %vm245_vm1, %v1089_v19, 0.0 }
 0x986   :  { %1094 = vadd.xlane.f32.xlu1 %v1093_v20 }
 0xa0b   :  { %v1092_v24 = vpop.xlane.xlu0 %1091 }
 0xa0c   :  { %v1096_v25 = vmul.f32 0.03125, %v1092_v24 }
 0xa0e   :  { %v1098_v3 = vadd.f32 1e-05, %v1096_v25 }
 0xa0f   :  { %v1095_v26 = vpop.xlane.xlu1 %1094 }
 0xa10   :  { %2588 = vrsqrt.f32 %v1098_v3  ;;  %v1097_v27 = vmul.f32 0.03125, %v1095_v26 }
 0xa12   :  { %v1099_v4 = vadd.f32 1e-05, %v1097_v27 }
 0xa14   :  { %2590 = vrsqrt.f32 %v1099_v4 }
 0xa1d   :  { %v2589_v30 = vpop.eup %2588 }
 0xa1e   :  { %v1102_v31 = vmul.f32 %v2589_v30, %v1086_v12 }
 0xa20   :  { %v1110_v34 = vmul.f32 %v2162_v15, %v1102_v31 }
 0xa21   :  { %v2591_v32 = vpop.eup %2590 }
 0xa22   :  { %v1103_v33 = vmul.f32 %v2591_v32, %v1087_v17  ;;  %v3136_v37 = vadd.f32 %v2163_v35, %v1110_v34 }
 0xa24   :  { %v1111_v36 = vmul.f32 %v2162_v15, %v1103_v33 }
 0xa26   :  { %v3138_v38 = vadd.f32 %v2163_v35, %v1111_v36 }
 0xa28   :  { %v1120_v39 = vpack.c.bf16 %v3138_v38, %v3136_v37 }
 0xa2a   :  { %2353 = vmatmul.mubr.msk.bf16.vlgmr.msra.gmra.mxu0 %vm245_vm1, %v1120_v39 }
 0xa2b   :  { %2358 = vmatprep.mubr.msk.bf16.mxu0 %vm2795_vm0, %v2794_v0 }
 0xaea   :  { %v1176_v40 = vpop.f32.mrf.mxu0 }
 0xaeb   :  { %v1177_v46 = vadd.f32 %v2164_v41, %v1176_v40 }
 0xaec   :  { %v2354_v43 = vpop.f32.mrf.mxu0 }
 0xaee   :  { %v1179_v44 = vpop.f32.mrf.mxu0 }
 0xaef   :  { %v1180_v47 = vadd.f32 %v2164_v41, %v1179_v44 }
 0xaf0   :  { %v2355_v48 = vpop.f32.mrf.mxu0 }
 0xaf1   :  { %v2505_v49 = vpack.i.bf16 %v1180_v47, %v1177_v46  ;;  %v3150_v50 = vpack.c.bf16 %v1180_v47, %v1177_v46 }
 0xaf3   :  { %2506 = vrot.lane.b32.xlu1 %v2505_v49, %s2799_s27  ;;  %2501 = vrot.lane.b32.xlu0 %v2505_v49, %s2797_s19 }
 0xaf7   :  { %2511 = vrot.lane.b32.xlu1 %v2505_v49, %s2796_s28  ;;  %1208 = vrot.lane.b32.xlu0 %v3150_v50, %s2800_s29 }
 0xb65   :  { %v2507_v51 = vpop.permute.xlu1 %2506  ;;  %v2502_v52 = vpop.permute.xlu0 %2501 }
 0xb66   :  { %v2509_v53 = vunpack.i.h.bf16 %v2507_v51  ;;  %v2508_v54 = vunpack.i.l.bf16 %v2507_v51  ;;  %v2504_v55 = vunpack.i.h.bf16 %v2502_v52  ;;  %v2503_v56 = vunpack.i.l.bf16 %v2502_v52 }
 0xb68   :  { %v3155_v57 = vpack.c.bf16 %v2509_v53, %v2508_v54  ;;  %v3157_v58 = vpack.c.bf16 %v2504_v55, %v2503_v56 }
 0xb69   :  { %v2512_v59 = vpop.permute.xlu1 %2511  ;;  %v1209_v60 = vpop.permute.xlu0 %1208 }
 0xb6a   :  { %v2514_v61 = vunpack.i.h.bf16 %v2512_v59  ;;  %v2513_v62 = vunpack.i.l.bf16 %v2512_v59  ;;  %v1214_v63 = vsel %vm317_vm2, %v1209_v60, 0  ;;  %1258 = vrot.lane.b32.xlu1 %v3157_v58, %s2800_s29  ;;  %1308 = vrot.lane.b32.xlu0 %v3155_v57, %s2800_s29 }
 0xb6b   :  { %2357 = vmatpush3.bf16.xpose.msra.mxu0 %v1214_v63 }
 0xb6c   :  { %v3164_v1 = vpack.c.bf16 %v2514_v61, %v2513_v62  ;;  %2368 = vmatprep.subr.bf16.mxu0 %v2794_v0 }
 0xb6e   :  { %1358 = vrot.lane.b32.xlu1 %v3164_v1, %s2800_s29 }
 0xb72   :  { %2359 = vmatmul.mubr.msk.bf16.vlgmr.msra.gmra.mxu0 %vm317_vm2, %v3150_v50 }
 0xb73   :  { %2370 = vmatprep.mubr.msk.bf16.mxu0 %vm2795_vm0, %v2794_v0 }
 0xbdc   :  { %v1259_v2 = vpop.permute.xlu1 %1258  ;;  %v1309_v5 = vpop.permute.xlu0 %1308 }
 0xbdd   :  { %v1264_v6 = vsel %vm317_vm2, %v1259_v2, 0  ;;  %v1314_v29 = vsel %vm317_vm2, %v1309_v5, 0 }
 0xbde   :  { %2363 = vmatpush3.bf16.xpose.msra.mxu1 %v1264_v6  ;;  %2369 = vmatpush3.bf16.xpose.msra.mxu0 %v1314_v29 }
 0xbdf   :  { %2374 = vmatprep.subr.bf16.mxu1 %v2794_v0  ;;  %2380 = vmatprep.subr.bf16.mxu0 %v2794_v0 }
 0xbe0   :  { %v1359_v28 = vpop.permute.xlu1 %1358 }
 0xbe1   :  { %v1364_v7 = vsel %vm317_vm2, %v1359_v28, 0 }
 0xbe5   :  { %2365 = vmatmul.mubr.msk.bf16.vlgmr.msra.gmra.mxu1 %vm317_vm2, %v3157_v58  ;;  %2371 = vmatmul.mubr.msk.bf16.vlgmr.msra.gmra.mxu0 %vm317_vm2, %v3155_v57 }
 0xbe6   :  { %2375 = vmatpush3.bf16.xpose.msra.mxu1 %v1364_v7  ;;  %2376 = vmatprep.mubr.msk.bf16.mxu1 %vm2795_vm0, %v2794_v0 }
 0xbe7   :  { %2382 = vmatprep.mubr.msk.bf16.mxu0 %vm2795_vm0, %v2794_v0  ;;  %2386 = vmatprep.subr.bf16.mxu1 %v2794_v0 }
 0xbed   :  { %2377 = vmatmul.mubr.msk.bf16.vlgmr.msra.gmra.mxu1 %vm317_vm2, %v3164_v1 }
 0xbee   :  { %2388 = vmatprep.mubr.msk.bf16.mxu1 %vm2795_vm0, %v2794_v0 }
 0xc32   :  { %v1250_v22 = vpop.f32.mrf.mxu0 }
 0xc33   :  { %v1251_v8 = vadd.f32 %v1250_v22, %v3001_v42 }
 0xc34   :  { %v2360_v9 = vpop.f32.mrf.mxu0 }
 0xc35   :  { %v1407_v10 = vsel %vm515_vm5, %v1251_v8, -inf }
 0xc36   :  { %1408 = vmax.xlane.f32.xlu0 %v1407_v10  ;;  %v1253_v11 = vpop.f32.mrf.mxu0 }
 0xc37   :  { %v1254_v12 = vadd.f32 %v1253_v11, %v3004_v45 }
 0xc38   :  { %v2361_v13 = vpop.f32.mrf.mxu0 }
 0xc39   :  { %v1410_v14 = vsel %vm515_vm5, %v1254_v12, -inf }
 0xc3a   :  { %1411 = vmax.xlane.f32.xlu1 %v1410_v14 }
 0xca5   :  { %v1300_v16 = vpop.f32.mrf.mxu1  ;;  %v1350_v17 = vpop.f32.mrf.mxu0 }
 0xca6   :  { %v1301_v18 = vadd.f32 %v1300_v16, %v3001_v42  ;;  %v1351_v19 = vadd.f32 %v1350_v17, %v3001_v42 }
 0xca7   :  { %v2366_v20 = vpop.f32.mrf.mxu1  ;;  %v2372_v21 = vpop.f32.mrf.mxu0 }
 0xca8   :  { %v1413_v23 = vsel %vm515_vm5, %v1301_v18, -inf  ;;  %v1419_v24 = vsel %vm515_vm5, %v1351_v19, -inf }
 0xca9   :  { %v1303_v25 = vpop.f32.mrf.mxu1  ;;  %1414 = vmax.xlane.f32.xlu0 %v1413_v23  ;;  %1420 = vmax.xlane.f32.xlu1 %v1419_v24  ;;  %v1353_v3 = vpop.f32.mrf.mxu0 }
 0xcaa   :  { %v1304_v26 = vadd.f32 %v1303_v25, %v3004_v45  ;;  %v1354_v30 = vadd.f32 %v1353_v3, %v3004_v45 }
 0xcab   :  { %v2367_v27 = vpop.f32.mrf.mxu1  ;;  %v2373_v4 = vpop.f32.mrf.mxu0 }
 0xcac   :  { %v1416_v31 = vsel %vm515_vm5, %v1304_v26, -inf  ;;  %v1422_v35 = vsel %vm515_vm5, %v1354_v30, -inf }
 0xcad   :  { %v1400_v15 = vpop.f32.mrf.mxu1  ;;  %1417 = vmax.xlane.f32.xlu0 %v1416_v31 }
 0xcae   :  { %v1401_v32 = vadd.f32 %v1400_v15, %v3001_v42 }
 0xcaf   :  { %v2378_v33 = vpop.f32.mrf.mxu1 }
 0xcb0   :  { %v1425_v34 = vsel %vm515_vm5, %v1401_v32, -inf }
 0xcb1   :  { %v1403_v36 = vpop.f32.mrf.mxu1  ;;  %1426 = vmax.xlane.f32.xlu1 %v1425_v34  ;;  %1423 = vmax.xlane.f32.xlu0 %v1422_v35 }
 0xcb2   :  { %v1404_v39 = vadd.f32 %v1403_v36, %v3004_v45 }
 0xcb3   :  { %v2379_v40 = vpop.f32.mrf.mxu1 }
 0xcb4   :  { %v1428_v41 = vsel %vm515_vm5, %v1404_v39, -inf }
 0xcb5   :  { %1429 = vmax.xlane.f32.xlu0 %v1428_v41 }
 0xcbf   :  { %v1409_v46 = vpop.xlane.xlu0 %1408 }
 0xcc0   :  { %v1431_v47 = vsub.f32 %v1251_v8, %v1409_v46 }
 0xcc2   :  { %1499 = vrot.lane.b32.xlu1 %v3150_v50, %s2792_s3  ;;  %v1439_v48 = vmul.f32 1.442695, %v1431_v47 }
 0xcc3   :  { %v1412_v43 = vpop.xlane.xlu1 %1411 }
 0xcc4   :  { %v1432_v44 = vsub.f32 %v1254_v12, %v1412_v43 }
 0xcc6   :  { %v1441_v42 = vmul.f32 1.442695, %v1432_v44 }
 0xcc8   :  { %2592 = vpow2.f32 %v1441_v42 }
 0xcc9   :  { %2594 = vpow2.f32 %v1439_v48 }
 0xcd5   :  { %v2593_v49 = vpop.eup %2592 }
 0xcd6   :  { %v1458_v51 = vsel %vm515_vm5, %v2593_v49, 0.0  ;;  %v2595_v45 = vpop.eup %2594 }
 0xcd7   :  { %1459 = vadd.xlane.f32.xlu0 %v1458_v51  ;;  %v1455_v52 = vsel %vm515_vm5, %v2595_v45, 0.0 }
 0xce6   :  { %1456 = vadd.xlane.f32.xlu1 %v1455_v52 }
 0xd32   :  { %v1415_v53 = vpop.xlane.xlu0 %1414  ;;  %v1421_v54 = vpop.xlane.xlu1 %1420 }
 0xd33   :  { %v1433_v55 = vsub.f32 %v1301_v18, %v1415_v53  ;;  %v1435_v50 = vsub.f32 %v1351_v19, %v1421_v54 }
 0xd35   :  { %v1443_v56 = vmul.f32 1.442695, %v1433_v55  ;;  %v1447_v59 = vmul.f32 1.442695, %v1435_v50 }
 0xd36   :  { %v1418_v60 = vpop.xlane.xlu0 %1417 }
 0xd37   :  { %2596 = vpow2.f32 %v1443_v56  ;;  %v1434_v61 = vsub.f32 %v1304_v26, %v1418_v60 }
 0xd38   :  { %2598 = vpow2.f32 %v1447_v59  ;;  %v2542_v59 = vld [vmem:[%s3329_s6 + $0x18] sm:$0xff]  }
 0xd39   :  { %v1445_v62 = vmul.f32 1.442695, %v1434_v61 }
 0xd3a   :  { %v1427_v63 = vpop.xlane.xlu1 %1426  ;;  %v1424_v2 = vpop.xlane.xlu0 %1423 }
 0xd3b   :  { %2600 = vpow2.f32 %v1445_v62  ;;  %v1437_v5 = vsub.f32 %v1401_v32, %v1427_v63  ;;  %v1436_v6 = vsub.f32 %v1354_v30, %v1424_v2  ;;  %v2543_v62 = vld [vmem:[%s3329_s6 + $0x10] sm:$0xff]  }
 0xd3d   :  { %v1451_v29 = vmul.f32 1.442695, %v1437_v5  ;;  %v1449_v28 = vmul.f32 1.442695, %v1436_v6 }
 0xd3e   :  { %v1500_v7 = vpop.permute.xlu1 %1499  ;;  %v1430_v22 = vpop.xlane.xlu0 %1429 }
 0xd3f   :  { %2602 = vpow2.f32 %v1451_v29  ;;  %v1438_v8 = vsub.f32 %v1404_v39, %v1430_v22  ;;  %2381 = vmatpush3.bf16.msra.mxu0 %v1500_v7 }
 0xd40   :  { %2604 = vpow2.f32 %v1449_v28  ;;  %2392 = vmatprep.subr.bf16.mxu0 %v2794_v0 }
 0xd41   :  { %v1453_v9 = vmul.f32 1.442695, %v1438_v8 }
 0xd43   :  { %2606 = vpow2.f32 %v1453_v9 }
 0xd44   :  { %v2597_v10 = vpop.eup %2596 }
 0xd45   :  { %v1461_v11 = vsel %vm515_vm5, %v2597_v10, 0.0  ;;  %v2599_v12 = vpop.eup %2598 }
 0xd46   :  { %1462 = vadd.xlane.f32.xlu1 %v1461_v11  ;;  %v1467_v14 = vsel %vm515_vm5, %v2599_v12, 0.0 }
 0xd48   :  { %v2601_v13 = vpop.eup %2600 }
 0xd49   :  { %v1464_v16 = vsel %vm515_vm5, %v2601_v13, 0.0 }
 0xd4a   :  { %1468 = vadd.xlane.f32.xlu1 %v1467_v14  ;;  %1465 = vadd.xlane.f32.xlu0 %v1464_v16 }
 0xd4c   :  { %v2603_v17 = vpop.eup %2602 }
 0xd4d   :  { %v2605_v18 = vpop.eup %2604  ;;  %v1473_v19 = vsel %vm515_vm5, %v2603_v17, 0.0 }
 0xd4e   :  { %1474 = vadd.xlane.f32.xlu1 %v1473_v19  ;;  %v1470_v20 = vsel %vm515_vm5, %v2605_v18, 0.0 }
 0xd4f   :  { %1471 = vadd.xlane.f32.xlu0 %v1470_v20 }
 0xd50   :  { %v2607_v21 = vpop.eup %2606 }
 0xd51   :  { %v1476_v23 = vsel %vm515_vm5, %v2607_v21, 0.0 }
 0xd53   :  { %1477 = vadd.xlane.f32.xlu0 %v1476_v23 }
 0xd5f   :  { %1593 = vrot.lane.b32.xlu1 %v3155_v57, %s2792_s3 }
 0xd60   :  { %v1460_v24 = vpop.xlane.xlu0 %1459 }
 0xd61   :  { %2608 = vrcp.f32 %v1460_v24 }
 0xd63   :  { %1640 = vrot.lane.b32.xlu1 %v3164_v1, %s2792_s3 }
 0xd69   :  { %1546 = vrot.lane.b32.xlu0 %v3157_v58, %s2792_s3  ;;  %s2752_s3 = scalar_lea.vmem %s2122_s5, 32 }
 0xd6a   :  { %p2753_p2 = scmp.ne.s32.totalorder %s2122_s5, %s2752_s3  ;;  %p2758_p4 = scmp.lt.s32.totalorder %s2752_s3, %s2752_s3 }
 0xd6c   :  { %p2759_p5 = por %p2758_p4, %p2757_p3 }
 0xd6e   :  { %v2609_v3 = vpop.eup %2608  ;;  %p2760_p6 = pnand %p2759_p5, %p2753_p2 }
 0xd6f   :  { %v1457_v25 = vpop.xlane.xlu1 %1456  ;;  %v1482_v4 = vmul.f32 %v2609_v3, %v2593_v49 }
 0xd70   :  { %2610 = vrcp.f32 %v1457_v25 }
 0xd7d   :  { %v2611_v26 = vpop.eup %2610 }
 0xd7e   :  { %v1480_v27 = vmul.f32 %v2611_v26, %v2595_v45 }
 0xd80   :  { %v1495_v30 = vpack.c.bf16 %v1482_v4, %v1480_v27 }
 0xd82   :  { %2383 = vmatmul.mubr.msk.bf16.vlgmr.msra.gmra.mxu0 %vm515_vm5, %v1495_v30 }
 0xd83   :  { %2394 = vmatprep.mubr.msk.bf16.mxu0 %vm2795_vm0, %v2794_v0 }
 0xdcf   :  { %v1463_v57 = vpop.xlane.xlu1 %1462 }
 0xdd0   :  { %2612 = vrcp.f32 %v1463_v57  ;;  %v2176_v57 = vld [vmem:[%s3330_s7 + $0x1] ss:$0 sm:$0xff] }
 0xdd3   :  { %v1469_v1 = vpop.xlane.xlu1 %1468  ;;  %v1466_v31 = vpop.xlane.xlu0 %1465 }
 0xdd4   :  { %2614 = vrcp.f32 %v1466_v31 }
 0xdd5   :  { %2616 = vrcp.f32 %v1469_v1 }
 0xdd7   :  { %v1475_v58 = vpop.xlane.xlu1 %1474 }
 0xdd8   :  { %v1472_v15 = vpop.xlane.xlu0 %1471 }
 0xdd9   :  { %2618 = vrcp.f32 %v1472_v15 }
 0xdda   :  { %2620 = vrcp.f32 %v1475_v58 }
 0xddb   :  { %v1594_v32 = vpop.permute.xlu1 %1593 }
 0xddc   :  { %v1478_v33 = vpop.xlane.xlu0 %1477  ;;  %2393 = vmatpush3.bf16.msra.mxu0 %v1594_v32 }
 0xddd   :  { %2622 = vrcp.f32 %v1478_v33  ;;  %2404 = vmatprep.subr.bf16.mxu0 %v2794_v0  ;;  %v2613_v34 = vpop.eup %2612 }
 0xdde   :  { %v1484_v39 = vmul.f32 %v2613_v34, %v2597_v10 }
 0xddf   :  { %v1641_v42 = vpop.permute.xlu1 %1640 }
 0xde0   :  { %v1547_v35 = vpop.permute.xlu0 %1546 }
 0xde1   :  { %2387 = vmatpush3.bf16.msra.mxu1 %v1547_v35  ;;  %v2615_v36 = vpop.eup %2614 }
 0xde2   :  { %2398 = vmatprep.subr.bf16.mxu1 %v2794_v0  ;;  %v1486_v40 = vmul.f32 %v2615_v36, %v2601_v13  ;;  %v2617_v41 = vpop.eup %2616 }
 0xde3   :  { %v1488_v46 = vmul.f32 %v2617_v41, %v2599_v12 }
 0xde4   :  { %v1496_v43 = vpack.c.bf16 %v1486_v40, %v1484_v39 }
 0xde6   :  { %v2619_v44 = vpop.eup %2618  ;;  %2389 = vmatmul.mubr.msk.bf16.vlgmr.msra.gmra.mxu1 %vm515_vm5, %v1496_v43 }
 0xde7   :  { %v1490_v47 = vmul.f32 %v2619_v44, %v2605_v18  ;;  %v2621_v48 = vpop.eup %2620  ;;  %2399 = vmatpush3.bf16.msra.mxu1 %v1641_v42  ;;  %2400 = vmatprep.mubr.msk.bf16.mxu1 %vm2795_vm0, %v2794_v0 }
 0xde8   :  { %2412 = vmatprep.subr.bf16.mxu1 %v2794_v0  ;;  %v1492_v45 = vmul.f32 %v2621_v48, %v2603_v17 }
 0xde9   :  { %v1497_v49 = vpack.c.bf16 %v1490_v47, %v1488_v46 }
 0xdea   :  { %v2623_v51 = vpop.eup %2622 }
 0xdeb   :  { %2395 = vmatmul.mubr.msk.bf16.vlgmr.msra.gmra.mxu0 %vm515_vm5, %v1497_v49  ;;  %v1494_v52 = vmul.f32 %v2623_v51, %v2607_v21  ;;  %v2545_v51 = vld [vmem:[%s3333_s10 + $0x10] sm:$0xff]  }
 0xdec   :  { %2408 = vmatprep.mubr.msk.bf16.mxu0 %vm2795_vm0, %v2794_v0  ;;  %2405 = vmatpush3.bf16.msra.mxu0 %v2542_v59 }
 0xded   :  { %v1498_v53 = vpack.c.bf16 %v1494_v52, %v1492_v45  ;;  %2406 = vmatprep.subr.bf16.mxu0 %v2794_v0  ;;  %v2546_v45 = vld [vmem:[%s3335_s12 + $0x38] sm:$0xff]  }
 0xdef   :  { %2401 = vmatmul.mubr.msk.bf16.vlgmr.msra.gmra.mxu1 %vm515_vm5, %v1498_v53 }
 0xdf0   :  { %2416 = vmatprep.mubr.msk.bf16.mxu1 %vm2795_vm0, %v2794_v0  ;;  %2407 = vmatpush3.bf16.msra.mxu0 %v2543_v62 }
 0xdf1   :  { %2420 = vmatprep.subr.bf16.mxu0 %v2794_v0 }
 0xe42   :  { %v1539_v54 = vpop.f32.mrf.mxu0 }
 0xe44   :  { %v2384_v55 = vpop.f32.mrf.mxu0 }
 0xe46   :  { %v1542_v50 = vpop.f32.mrf.mxu0 }
 0xe48   :  { %v2385_v56 = vpop.f32.mrf.mxu0 }
 0xea6   :  { %v1586_v60 = vpop.f32.mrf.mxu1 }
 0xea8   :  { %v2390_v61 = vpop.f32.mrf.mxu1 }
 0xea9   :  { %v2180_v61 = vld [vmem:[%s3331_s8 + $0x1] ss:$0 sm:$0xff] }
 0xeaa   :  { %v1589_v63 = vpop.f32.mrf.mxu1 }
 0xeab   :  { %v1633_v2 = vpop.f32.mrf.mxu0  ;;  %v2515_v5 = vpack.i.bf16 %v1589_v63, %v1586_v60 }
 0xeac   :  { %v2391_v6 = vpop.f32.mrf.mxu1 }
 0xead   :  { %v2396_v29 = vpop.f32.mrf.mxu0  ;;  %2516 = vrot.lane.b32.xlu0 %v2515_v5, %s2788_s0  ;;  %v2181_v5 = vld [vmem:[#allocation8 + $0x1] ss:$0 sm:$0xff] }
 0xeaf   :  { %v1636_v28 = vpop.f32.mrf.mxu0  ;;  %v1680_v7 = vpop.f32.mrf.mxu1 }
 0xeb0   :  { %v2520_v22 = vpack.i.bf16 %v1636_v28, %v1633_v2 }
 0xeb1   :  { %v2397_v8 = vpop.f32.mrf.mxu0  ;;  %v2402_v9 = vpop.f32.mrf.mxu1 }
 0xeb2   :  { %2521 = vrot.lane.b32.xlu1 %v2520_v22, %s2784_s2  ;;  %v2547_v22 = vld [vmem:[%s3335_s12 + $0x30] sm:$0xff]   ;;  %v2548_v8 = vld [vmem:[%s3335_s12 + $0x28] sm:$0xff]   ;;  %v2549_v9 = vld [vmem:[%s3335_s12 + $0x20] sm:$0xff]  }
 0xeb3   :  { %v1683_v10 = vpop.f32.mrf.mxu1 }
 0xeb4   :  { %v2525_v11 = vpack.i.bf16 %v1683_v10, %v1680_v7  ;;  %v2182_v10 = vld [vmem:[#allocation10 + $0x1] ss:$0 sm:$0xff] }
 0xeb5   :  { %v2403_v12 = vpop.f32.mrf.mxu1 }
 0xeb6   :  { %2526 = vrot.lane.b32.xlu0 %v2525_v11, %s2802_s30 }
 0xf1f   :  { %v2517_v13 = vpop.permute.xlu0 %2516 }
 0xf20   :  { %v2519_v16 = vunpack.i.h.bf16 %v2517_v13  ;;  %v2518_v17 = vunpack.i.l.bf16 %v2517_v13 }
 0xf22   :  { %v1711_v21 = vsel %vm317_vm2, %v1539_v54, %v2518_v17  ;;  %v1712_v23 = vsel %vm317_vm2, %v1542_v50, %v2519_v16 }
 0xf24   :  { %v2522_v14 = vpop.permute.xlu1 %2521 }
 0xf25   :  { %v2524_v18 = vunpack.i.h.bf16 %v2522_v14  ;;  %v2523_v19 = vunpack.i.l.bf16 %v2522_v14 }
 0xf27   :  { %v1714_v3 = vsel %vm515_vm5, %v1712_v23, %v2524_v18  ;;  %v1713_v26 = vsel %vm515_vm5, %v1711_v21, %v2523_v19  ;;  %v2186_v21 = vld [vmem:[%s3336_s13 + $0x1] ss:$0 sm:$0xff] }
 0xf28   :  { %v2527_v20 = vpop.permute.xlu0 %2526 }
 0xf29   :  { %v2529_v24 = vunpack.i.h.bf16 %v2527_v20  ;;  %v2528_v25 = vunpack.i.l.bf16 %v2527_v20 }
 0xf2b   :  { %v1715_v27 = vsel %vm824_vm6, %v1713_v26, %v2528_v25  ;;  %v1716_v4 = vsel %vm824_vm6, %v1714_v3, %v2529_v24 }
 0xf2c   :  { %v1717_v30 = vpack.c.bf16 %v1716_v4, %v1715_v27 }
 0xf2e   :  { %2409 = vmatmul.mubr.msk.bf16.vlgmr.msra.gmra.mxu0 %vm245_vm1, %v1717_v30 }
 0xf2f   :  { %2428 = vmatprep.mubr.msk.bf16.mxu0 %vm2795_vm0, %v2794_v0  ;;  %2421 = vmatpush3.bf16.msra.mxu0 %v2546_v45 }
 0xf30   :  { %2422 = vmatprep.subr.bf16.mxu0 %v2794_v0 }
 0xf33   :  { %2423 = vmatpush3.bf16.msra.mxu0 %v2547_v22 }
 0xf34   :  { %2424 = vmatprep.subr.bf16.mxu0 %v2794_v0 }
 0xf37   :  { %2425 = vmatpush3.bf16.msra.mxu0 %v2548_v8 }
 0xf38   :  { %2426 = vmatprep.subr.bf16.mxu0 %v2794_v0 }
 0xf3b   :  { %2427 = vmatpush3.bf16.msra.mxu0 %v2549_v9 }
 0xfee   :  { %v1773_v1 = vpop.f32.mrf.mxu0 }
 0xfef   :  { %v1774_v31 = vadd.f32 %v2176_v57, %v1773_v1 }
 0xff0   :  { %v2410_v58 = vpop.f32.mrf.mxu0 }
 0xff1   :  { %v1780_v15 = vadd.f32 %v1774_v31, %v3136_v37 }
 0xff2   :  { %v1776_v32 = vpop.f32.mrf.mxu0 }
 0xff3   :  { %v1777_v33 = vadd.f32 %v2176_v57, %v1776_v32  ;;  %v1782_v34 = vsel %vm245_vm1, %v1780_v15, 0.0 }
 0xff4   :  { %1783 = vadd.xlane.f32.xlu1 %v1782_v34  ;;  %v2411_v35 = vpop.f32.mrf.mxu0 }
 0xff5   :  { %v1781_v36 = vadd.f32 %v1777_v33, %v3138_v38  ;;  %v2544_v38 = vld [vmem:[%s3333_s10 + $0x18] sm:$0xff]  }
 0xff6   :  { %2413 = vmatpush3.bf16.msra.mxu1 %v2544_v38 }
 0xff7   :  { %v1785_v39 = vsel %vm245_vm1, %v1781_v36, 0.0  ;;  %2414 = vmatprep.subr.bf16.mxu1 %v2794_v0 }
 0xff8   :  { %1786 = vadd.xlane.f32.xlu0 %v1785_v39 }
 0xffa   :  { %2415 = vmatpush3.bf16.msra.mxu1 %v2545_v51 }
 0xffb   :  { %2432 = vmatprep.subr.bf16.mxu1 %v2794_v0 }
0x107d   :  { %v1784_v40 = vpop.xlane.xlu1 %1783 }
0x107e   :  { %v1788_v41 = vmul.f32 0.03125, %v1784_v40 }
0x1080   :  { %v1790_v43 = vsub.f32 %v1780_v15, %v1788_v41 }
0x1081   :  { %v1787_v44 = vpop.xlane.xlu0 %1786 }
0x1082   :  { %v1789_v42 = vmul.f32 0.03125, %v1787_v44  ;;  %v1792_v46 = vmul.f32 %v1790_v43, %v1790_v43 }
0x1084   :  { %v1791_v47 = vsub.f32 %v1781_v36, %v1789_v42  ;;  %v1794_v37 = vsel %vm245_vm1, %v1792_v46, 0.0 }
0x1085   :  { %1795 = vadd.xlane.f32.xlu0 %v1794_v37 }
0x1086   :  { %v1793_v48 = vmul.f32 %v1791_v47, %v1791_v47 }
0x1088   :  { %v1797_v49 = vsel %vm245_vm1, %v1793_v48, 0.0 }
0x1089   :  { %1798 = vadd.xlane.f32.xlu1 %v1797_v49  ;;  %v2192_v49 = vld [vmem:[%s3337_s14 + $0x1] ss:$0 sm:$0xff] }
0x110e   :  { %v1796_v52 = vpop.xlane.xlu0 %1795 }
0x110f   :  { %v1800_v53 = vmul.f32 0.03125, %v1796_v52  ;;  %v2193_v52 = vld [vmem:[%s3338_s15 + $0x1] ss:$0 sm:$0xff] }
0x1111   :  { %v1802_v54 = vadd.f32 1e-05, %v1800_v53 }
0x1112   :  { %v1799_v55 = vpop.xlane.xlu1 %1798 }
0x1113   :  { %2624 = vrsqrt.f32 %v1802_v54  ;;  %v1801_v50 = vmul.f32 0.03125, %v1799_v55 }
0x1115   :  { %v1803_v56 = vadd.f32 1e-05, %v1801_v50 }
0x1117   :  { %2626 = vrsqrt.f32 %v1803_v56  ;;  %v144_v56 = vld [vmem:[#allocation7] sm:$0x1] }
0x1120   :  { %v2625_v59 = vpop.eup %2624 }
0x1121   :  { %v1806_v60 = vmul.f32 %v2625_v59, %v1790_v43  ;;  %v2550_v59 = vld [vmem:[#allocation11 + $0x8] sm:$0xff]  }
0x1123   :  { %v1814_v2 = vmul.f32 %v2180_v61, %v1806_v60  ;;  %v2551_v60 = vld [vmem:[#allocation11] sm:$0xff]  }
0x1124   :  { %v2627_v62 = vpop.eup %2626 }
0x1125   :  { %v1807_v63 = vmul.f32 %v2627_v62, %v1791_v47  ;;  %v1822_v29 = vadd.f32 %v2181_v5, %v1814_v2 }
0x1127   :  { %v1815_v6 = vmul.f32 %v2180_v61, %v1807_v63 }
0x1129   :  { %v1823_v28 = vadd.f32 %v2181_v5, %v1815_v6  ;;  %v2195_v6 = vld [vmem:[%s3340_s17] ss:$0 sm:$0xff] }
0x112b   :  { %v1824_v7 = vpack.c.bf16 %v1823_v28, %v1822_v29 }
0x112d   :  { %2417 = vmatmul.mubr.msk.bf16.vlgmr.msra.gmra.mxu1 %vm245_vm1, %v1824_v7 }
0x112e   :  { %2434 = vmatprep.mubr.msk.bf16.mxu1 %vm2795_vm0, %v2794_v0 }
0x11ed   :  { %v1880_v11 = vpop.f32.mrf.mxu1 }
0x11ee   :  { %v1881_v13 = vadd.f32 %v2182_v10, %v1880_v11 }
0x11ef   :  { %v2418_v12 = vpop.f32.mrf.mxu1 }
0x11f0   :  { %v1887_v18 = vmax.f32 %v1881_v13, 0.0 }
0x11f1   :  { %v1883_v14 = vpop.f32.mrf.mxu1 }
0x11f2   :  { %v1884_v16 = vadd.f32 %v2182_v10, %v1883_v14 }
0x11f3   :  { %v2419_v17 = vpop.f32.mrf.mxu1 }
0x11f4   :  { %v1888_v19 = vmax.f32 %v1884_v16, 0.0 }
0x11f6   :  { %v1889_v20 = vpack.c.bf16 %v1888_v19, %v1887_v18 }
0x11f8   :  { %2429 = vmatmul.mubr.msk.bf16.vlgmr.msra.gmra.mxu0 %vm1031_vm7, %v1889_v20 }
0x12b8   :  { %v1957_v23 = vpop.f32.mrf.mxu0 }
0x12b9   :  { %v1958_v24 = vadd.f32 %v2186_v21, %v1957_v23 }
0x12ba   :  { %v2430_v25 = vpop.f32.mrf.mxu0 }
0x12bb   :  { %v1964_v3 = vadd.f32 %v1958_v24, %v1822_v29 }
0x12bc   :  { %v1960_v26 = vpop.f32.mrf.mxu0 }
0x12bd   :  { %v1961_v27 = vadd.f32 %v2186_v21, %v1960_v26  ;;  %v1966_v4 = vsel %vm245_vm1, %v1964_v3, 0.0 }
0x12be   :  { %1967 = vadd.xlane.f32.xlu0 %v1966_v4  ;;  %v2431_v30 = vpop.f32.mrf.mxu0 }
0x12bf   :  { %v1965_v57 = vadd.f32 %v1961_v27, %v1823_v28 }
0x12c1   :  { %v1969_v1 = vsel %vm245_vm1, %v1965_v57, 0.0 }
0x12c2   :  { %1970 = vadd.xlane.f32.xlu1 %v1969_v1 }
0x1347   :  { %v1968_v31 = vpop.xlane.xlu0 %1967 }
0x1348   :  { %v1972_v58 = vmul.f32 0.03125, %v1968_v31 }
0x134a   :  { %v1974_v15 = vsub.f32 %v1964_v3, %v1972_v58 }
0x134b   :  { %v1971_v32 = vpop.xlane.xlu1 %1970 }
0x134c   :  { %v1973_v33 = vmul.f32 0.03125, %v1971_v32  ;;  %v1976_v34 = vmul.f32 %v1974_v15, %v1974_v15 }
0x134e   :  { %v1975_v35 = vsub.f32 %v1965_v57, %v1973_v33  ;;  %v1978_v36 = vsel %vm245_vm1, %v1976_v34, 0.0 }
0x134f   :  { %1979 = vadd.xlane.f32.xlu0 %v1978_v36 }
0x1350   :  { %v1977_v39 = vmul.f32 %v1975_v35, %v1975_v35 }
0x1352   :  { %v1981_v40 = vsel %vm245_vm1, %v1977_v39, 0.0 }
0x1353   :  { %1982 = vadd.xlane.f32.xlu1 %v1981_v40 }
0x13d8   :  { %v1980_v41 = vpop.xlane.xlu0 %1979 }
0x13d9   :  { %v1984_v43 = vmul.f32 0.03125, %v1980_v41 }
0x13db   :  { %v1986_v44 = vadd.f32 1e-05, %v1984_v43 }
0x13dc   :  { %v1983_v42 = vpop.xlane.xlu1 %1982 }
0x13dd   :  { %2628 = vrsqrt.f32 %v1986_v44  ;;  %v1985_v46 = vmul.f32 0.03125, %v1983_v42 }
0x13df   :  { %v1987_v47 = vadd.f32 1e-05, %v1985_v46 }
0x13e1   :  { %2630 = vrsqrt.f32 %v1987_v47 }
0x13ea   :  { %v2629_v37 = vpop.eup %2628 }
0x13eb   :  { %v1990_v48 = vmul.f32 %v2629_v37, %v1974_v15 }
0x13ed   :  { %v1998_v45 = vmul.f32 %v2192_v49, %v1990_v48 }
0x13ee   :  { %v2631_v38 = vpop.eup %2630 }
0x13ef   :  { %v1991_v51 = vmul.f32 %v2631_v38, %v1975_v35  ;;  %v2006_v54 = vadd.f32 %v2193_v52, %v1998_v45 }
0x13f1   :  { %v1999_v53 = vmul.f32 %v2192_v49, %v1991_v51 }
0x13f3   :  { %v2007_v55 = vadd.f32 %v2193_v52, %v1999_v53 }
0x13f5   :  { %v2008_v50 = vpack.c.bf16 %v2007_v55, %v2006_v54 }
0x13f7   :  { %2433 = vmatpush3.bf16.msra.mxu1 %v2008_v50 }
0x13f8   :  { %2438 = vmatprep.subr.bf16.mxu1 %v2794_v0 }
0x13fa   :  { %2435 = vmatmul.mubr.msk.bf16.vlgmr.msra.gmra.mxu1 %vm515_vm5, %v144_v56 }
0x13fb   :  { %2439 = vmatpush3.bf16.msra.mxu1 %v2550_v59  ;;  %2442 = vmatprep.mubr.msk.bf16.mxu1 %vm2795_vm0, %v2794_v0 }
0x13fc   :  { %2440 = vmatprep.subr.bf16.mxu1 %v2794_v0 }
0x13ff   :  { %2441 = vmatpush3.bf16.msra.mxu1 %v2551_v60 }
0x14ba   :  { %v2046_v61 = vpop.f32.mrf.mxu1 }
0x14bb   :  { %v2052_v62 = vpack.c.bf16 %v2046_v61, %v2046_v61 }
0x14bc   :  { %v2436_v63 = vpop.f32.mrf.mxu1 }
0x14bd   :  { %2443 = vmatmul.mubr.msk.bf16.vlgmr.msra.gmra.mxu1 %vm245_vm1, %v2052_v62 }
0x14be   :  { %v2049_v2 = vpop.f32.mrf.mxu1 }
0x14c0   :  { %v2437_v5 = vpop.f32.mrf.mxu1 }
0x157d   :  { %v2108_v29 = vpop.f32.mrf.mxu1 }
0x157e   :  { %v2109_v28 = vadd.f32 %v2195_v6, %v2108_v29 }
0x157f   :  { %v2444_v7 = vpop.f32.mrf.mxu1 }
0x1580   :  { %2114 = vst [vmem:[#allocation13] sm:$0x3] %v2109_v28 }
0x1581   :  { %v2111_v0 = vpop.f32.mrf.mxu1 }
0x1582   :  { %2763 = shalt.err (!%p2760_p6)
}
0x1583   :  { %2124 = dma.vmem_to_hbm [thread:$0]  %s2122_s5, 32, %s3341_s18, [#allocation4]   ;;  %v2445_v22 = vpop.f32.mrf.mxu1 }
0x1584   :  { %2780 = dma.done.wait [#allocation4], 32  }
0x1585   :  { %2781 = vsyncadd [#allocation4], 4294967264 }
0x1586   :  { %2128 = vsyncpa [#allocation3], 1 }
0x1587   :  { %2129 = vsyncpa [#allocation6], 1 }
0x1588   :  { %2130 = vsyncpa [#allocation9], 1 }
0x1589   :  { %2131 = vsyncpa [#allocation12], 1 }
0x158a   :  { %2132 = vsyncpa [#allocation4], 1 }

</bundles_post_ra>
